<compile_context>
chip_gen: v7x
topology: tpu7x:2x2x1
jax: 0.10.0
libtpu: 0.0.40
codegen_flags: <defaults>
</compile_context>

<pallas_src>
import functools
import math

import jax
import jax.numpy as jnp
from jax import lax
from jax.experimental import pallas as pl
from jax.experimental.pallas import tpu as pltpu

_LANE = 128
_SUBLANE = 8


def _round_up(x, m):
    return (x + m - 1) // m * m


def _vmem_limit_bytes():
    # Derive the scoped-VMEM budget from the actual generation:
    # v5e/v6e (128 MiB physical) -> 96 MiB, v7x (64 MiB physical) -> 48 MiB.
    try:
        cap = int(pltpu.get_tpu_info().vmem_capacity_bytes)
    except Exception:
        cap = 64 * 1024 * 1024
    return min(cap * 3 // 4, 100 * 1024 * 1024)


def _compiler_params(dimension_semantics):
    return pltpu.CompilerParams(
        dimension_semantics=dimension_semantics,
        vmem_limit_bytes=_vmem_limit_bytes(),
    )


# ----------------------------------------------------------------------------
# LayerNorm over the first `d_real` lanes of a zero-padded (rows, Dp) slab.
# gamma/beta are zero in padded lanes, so the output keeps zero padding.
# ----------------------------------------------------------------------------
def _layernorm_padded(x, gamma, beta, d_real, lane_mask, eps=1e-5):
    inv_d = 1.0 / d_real
    mean = jnp.sum(x, axis=-1, keepdims=True) * inv_d
    centered = (x - mean) * lane_mask
    var = jnp.sum(centered * centered, axis=-1, keepdims=True) * inv_d
    return centered * lax.rsqrt(var + eps) * gamma + beta


def _dot_nt(a, b):
    """(M, K) x (N, K) -> (M, N), f32 accumulation (no explicit transpose)."""
    return lax.dot_general(a, b, (((1,), (1,)), ((), ())),
                           preferred_element_type=jnp.float32)


# ----------------------------------------------------------------------------
# Patch-embed + token assembly kernel (patches first, char prefix appended):
#   tokens[b, :P]  = patches[b] @ W_patch + (conv_bias + pos_embed[L:])
#   tokens[b, P:]  = char_tokens + pos_embed[:L]
# The big store starts at row 0 (sublane aligned, unmasked vst).
# ----------------------------------------------------------------------------
def _make_embed_kernel(num_patch_rows):
    def kernel(patches_ref, w_ref, bias_pos_ref, suffix_ref, o_ref):
        emb = jnp.dot(patches_ref[0], w_ref[...],
                      preferred_element_type=jnp.float32)
        o_ref[0, :num_patch_rows, :] = emb + bias_pos_ref[...]
        o_ref[0, num_patch_rows:, :] = suffix_ref[...]
    return kernel


def embed_tokens(patches, params):
    B, P, Cpp_pad = patches.shape
    L, Dp = params["tok_suffix"].shape
    T = P + L
    z2 = lambda b: (0, 0)
    return pl.pallas_call(
        _make_embed_kernel(P),
        out_shape=jax.ShapeDtypeStruct((B, T, Dp), jnp.float32),
        grid=(B,),
        in_specs=[
            pl.BlockSpec((1, P, Cpp_pad), lambda b: (b, 0, 0)),  # im2col patches (bf16)
            pl.BlockSpec((Cpp_pad, Dp), z2),                     # patch weight (bf16)
            pl.BlockSpec((P, Dp), z2),                           # conv bias + pos (patch rows)
            pl.BlockSpec((L, Dp), z2),                           # char tokens + pos (suffix rows)
        ],
        out_specs=pl.BlockSpec((1, T, Dp), lambda b: (b, 0, 0)),
        compiler_params=_compiler_params(("parallel",)),
    )(patches, params["patch_w"], params["patch_bias_pos"], params["tok_suffix"])


# ----------------------------------------------------------------------------
# Depth-fused transformer kernel.  grid = (B, depth); the token slab lives in
# a VMEM scratch across the depth axis, per-layer weights are indexed by the
# depth grid coordinate, and the char head runs as an epilogue of the last
# depth step over an 8-aligned query window of the last rows.
# ----------------------------------------------------------------------------
def _make_fused_kernel(d_real, head_dim_real, num_heads, q_rows_pad, eps=1e-5):
    H = num_heads
    scale = 1.0 / math.sqrt(head_dim_real)

    def kernel(x_ref, wqkv_ref, bqkv_ref, wo_ref, bo_ref,
               ln1w_ref, ln1b_ref, w1_ref, b1_ref, w2_ref, b2_ref,
               ln2w_ref, ln2b_ref, hw_ref, hb_ref, o_ref, tok_ref):
        d = pl.program_id(1)

        @pl.when(d == 0)
        def _():
            tok_ref[...] = x_ref[0]

        x = tok_ref[...]                               # (T, Dp) f32, zero-padded lanes
        T, Dp = x.shape
        hd_p = Dp // H
        lane_mask = (lax.broadcasted_iota(jnp.int32, (1, Dp), 1)
                     < d_real).astype(jnp.float32)

        x_bf = x.astype(jnp.bfloat16)

        # Merged QKV projection: one lane-dense (T, Dp) x (Dp, 3*Dp) matmul.
        qkv = jnp.dot(x_bf, wqkv_ref[0],
                      preferred_element_type=jnp.float32) + bqkv_ref[0]

        # Per-head scores / softmax / context from static lane slices.
        ctx = []
        for h in range(H):
            qh = qkv[:, h * hd_p:(h + 1) * hd_p]
            kh = qkv[:, Dp + h * hd_p: Dp + (h + 1) * hd_p]
            vh = qkv[:, 2 * Dp + h * hd_p: 2 * Dp + (h + 1) * hd_p]
            s = _dot_nt(qh.astype(jnp.bfloat16), kh.astype(jnp.bfloat16)) * scale
            s = s - jnp.max(s, axis=-1, keepdims=True)
            p = jnp.exp(s)
            p = p * pl.reciprocal(jnp.sum(p, axis=-1, keepdims=True), approx=True)
            ctx.append(jnp.dot(p.astype(jnp.bfloat16), vh.astype(jnp.bfloat16),
                               preferred_element_type=jnp.float32))
        o_cat = jnp.concatenate(ctx, axis=-1)          # (T, Dp)

        # Single lane-dense output projection.
        attn = jnp.dot(o_cat.astype(jnp.bfloat16), wo_ref[0],
                       preferred_element_type=jnp.float32) + bo_ref[0]

        # Residual + LN1, FFN, residual + LN2 (f32).
        h1 = _layernorm_padded(x + attn, ln1w_ref[0], ln1b_ref[0],
                               d_real, lane_mask, eps)
        hid = jnp.dot(h1.astype(jnp.bfloat16), w1_ref[0],
                      preferred_element_type=jnp.float32) + b1_ref[0]
        hid = jnp.maximum(hid, 0.0)
        ffn = jnp.dot(hid.astype(jnp.bfloat16), w2_ref[0],
                      preferred_element_type=jnp.float32) + b2_ref[0]
        y = _layernorm_padded(h1 + ffn, ln2w_ref[0], ln2b_ref[0],
                              d_real, lane_mask, eps)

        tok_ref[...] = y                               # stays resident for layer d+1

        @pl.when(d == pl.num_programs(1) - 1)
        def _():
            # Char head on the last q_rows_pad rows (8-aligned row count ->
            # unmasked logits store; real char rows are the last L of these).
            yq = y[T - q_rows_pad:, :]
            logits = jnp.dot(yq.astype(jnp.bfloat16), hw_ref[...],
                             preferred_element_type=jnp.float32) + hb_ref[...]
            o_ref[0] = logits.astype(o_ref.dtype)

    return kernel


def transformer(tokens, params, *, d_real, head_dim_real, num_heads, num_chars):
    B, T, Dp = tokens.shape
    depth = params["wqkv"].shape[0]
    Dhp = params["w1"].shape[2]
    Cp = params["head_w"].shape[1]
    q_rows_pad = min(_round_up(num_chars, _SUBLANE), T)

    xmap = lambda b, d: (b, 0, 0)
    wmap = lambda b, d: (d, 0, 0)
    cmap = lambda b, d: (0, 0)

    in_specs = [
        pl.BlockSpec((1, T, Dp), xmap),           # tokens (read at d == 0)
        pl.BlockSpec((1, Dp, 3 * Dp), wmap),      # W_qkv (bf16)
        pl.BlockSpec((1, 1, 3 * Dp), wmap),       # b_qkv
        pl.BlockSpec((1, Dp, Dp), wmap),          # W_out (bf16)
        pl.BlockSpec((1, 1, Dp), wmap),           # b_out
        pl.BlockSpec((1, 1, Dp), wmap),           # ln1 gamma
        pl.BlockSpec((1, 1, Dp), wmap),           # ln1 beta
        pl.BlockSpec((1, Dp, Dhp), wmap),         # ffn W1 (bf16)
        pl.BlockSpec((1, 1, Dhp), wmap),          # ffn b1
        pl.BlockSpec((1, Dhp, Dp), wmap),         # ffn W2 (bf16)
        pl.BlockSpec((1, 1, Dp), wmap),           # ffn b2
        pl.BlockSpec((1, 1, Dp), wmap),           # ln2 gamma
        pl.BlockSpec((1, 1, Dp), wmap),           # ln2 beta
        pl.BlockSpec((Dp, Cp), cmap),             # head W (bf16, constant index)
        pl.BlockSpec((1, Cp), cmap),              # head b (constant index)
    ]

    return pl.pallas_call(
        _make_fused_kernel(d_real, head_dim_real, num_heads, q_rows_pad),
        out_shape=jax.ShapeDtypeStruct((B, q_rows_pad, Cp), jnp.float32),
        grid=(B, depth),
        in_specs=in_specs,
        out_specs=pl.BlockSpec((1, q_rows_pad, Cp), lambda b, d: (b, 0, 0)),
        scratch_shapes=[pltpu.VMEM((T, Dp), jnp.float32)],   # resident token slab
        compiler_params=_compiler_params(("parallel", "arbitrary")),
    )(tokens, params["wqkv"], params["bqkv"], params["wo"], params["bo"],
      params["ln1_w"], params["ln1_b"], params["w1"], params["b1"],
      params["w2"], params["b2"], params["ln2_w"], params["ln2_b"],
      params["head_w"], params["head_b"])


# ----------------------------------------------------------------------------
# Parameter construction (deterministic, synthetic).  Returns
#   (packed kernel params, raw unpadded params for the pure-JAX reference).
# Layout mirrors PyTorch:
#   W_qkv columns: [Q heads | K heads | V heads], each head padded hd -> hd_p
#   W_out rows grouped per head (input = concatenated head contexts)
#   ffn Linear weights transposed; LN gamma=1 / beta=0 on real lanes.
# ----------------------------------------------------------------------------
def init_params(key, *, in_chans, embed_dim, num_heads, depth, num_class,
                batch_max_length, mlp_ratio, patch_size, img_size):
    ph, pw = patch_size
    P = (img_size[0] // ph) * (img_size[1] // pw)
    D = embed_dim
    H = num_heads
    hd = D // H
    Dh = mlp_ratio * D
    Cpp = in_chans * ph * pw
    L = batch_max_length
    T = P + L

    Dp = _round_up(D, _LANE)
    assert Dp % H == 0, "num_heads must divide the padded embed dim"
    hd_p = Dp // H
    Dhp = _round_up(Dh, _LANE)
    Cp = _round_up(num_class, _LANE)
    Cpp_pad = _round_up(Cpp, _LANE)

    def nrm(k, shape, scale=0.02):
        return (scale * jax.random.normal(k, shape)).astype(jnp.float32)

    def pad_to(a, shape):
        return jnp.pad(a, [(0, s - d) for d, s in zip(a.shape, shape)])

    keys = jax.random.split(key, 8 + depth)
    raw = {
        "patch_w": nrm(keys[0], (Cpp, D)),       # Conv2d weight reshaped + transposed
        "patch_b": nrm(keys[1], (D,)),
        "char_tokens": nrm(keys[2], (L, D)),
        "pos_embed": nrm(keys[3], (T, D)),
        "head_w": nrm(keys[4], (D, num_class)),
        "head_b": nrm(keys[5], (num_class,)),
        "blocks": [],
    }
    for d in range(depth):
        sk = jax.random.split(keys[8 + d], 12)
        raw["blocks"].append({
            "wq_t": nrm(sk[0], (D, D)), "wk_t": nrm(sk[1], (D, D)),
            "wv_t": nrm(sk[2], (D, D)),
            "bq": nrm(sk[3], (D,)), "bk": nrm(sk[4], (D,)), "bv": nrm(sk[5], (D,)),
            "wo_t": nrm(sk[6], (D, D)), "bo": nrm(sk[7], (D,)),
            "w1_t": nrm(sk[8], (D, Dh)), "b1": nrm(sk[9], (Dh,)),
            "w2_t": nrm(sk[10], (Dh, D)), "b2": nrm(sk[11], (D,)),
        })

    # ---- pack / pad for the kernels ----
    def head_grouped_cols(w_t):       # (D, D) -> (Dp, Dp): head h at cols [h*hd_p, h*hd_p+hd)
        w = w_t.reshape(D, H, hd)
        w = jnp.pad(w, ((0, Dp - D), (0, 0), (0, hd_p - hd)))
        return w.reshape(Dp, H * hd_p)

    def head_grouped_bias(b):         # (D,) -> (1, Dp)
        bb = jnp.pad(b.reshape(H, hd), ((0, 0), (0, hd_p - hd)))
        return bb.reshape(1, H * hd_p)

    def out_proj_rows(wo_t):          # (D, D) -> (Dp, Dp): rows grouped per head
        w = wo_t.reshape(H, hd, D)
        w = jnp.pad(w, ((0, 0), (0, hd_p - hd), (0, Dp - D)))
        return w.reshape(H * hd_p, Dp)

    ones_pad = pad_to(jnp.ones((1, D), jnp.float32), (1, Dp))
    zeros_pad = jnp.zeros((1, Dp), jnp.float32)

    wqkv, bqkv, wo, bo = [], [], [], []
    ln1w, ln1b, ln2w, ln2b = [], [], [], []
    w1, b1, w2, b2 = [], [], [], []
    for blk in raw["blocks"]:
        wqkv.append(jnp.concatenate(
            [head_grouped_cols(blk["wq_t"]),
             head_grouped_cols(blk["wk_t"]),
             head_grouped_cols(blk["wv_t"])], axis=1).astype(jnp.bfloat16))
        bqkv.append(jnp.concatenate(
            [head_grouped_bias(blk["bq"]),
             head_grouped_bias(blk["bk"]),
             head_grouped_bias(blk["bv"])], axis=1))
        wo.append(out_proj_rows(blk["wo_t"]).astype(jnp.bfloat16))
        bo.append(pad_to(blk["bo"].reshape(1, D), (1, Dp)))
        ln1w.append(ones_pad); ln1b.append(zeros_pad)
        ln2w.append(ones_pad); ln2b.append(zeros_pad)
        w1.append(pad_to(blk["w1_t"], (Dp, Dhp)).astype(jnp.bfloat16))
        b1.append(pad_to(blk["b1"].reshape(1, Dh), (1, Dhp)))
        w2.append(pad_to(blk["w2_t"], (Dhp, Dp)).astype(jnp.bfloat16))
        b2.append(pad_to(blk["b2"].reshape(1, D), (1, Dp)))

    params = {
        # patch embed (patches-first token order; char prefix appended last)
        "patch_w": pad_to(raw["patch_w"], (Cpp_pad, Dp)).astype(jnp.bfloat16),
        "patch_bias_pos": pad_to(raw["pos_embed"][L:] + raw["patch_b"][None, :], (P, Dp)),
        "tok_suffix": pad_to(raw["char_tokens"] + raw["pos_embed"][:L], (L, Dp)),
        # transformer weights stacked along depth for the fused grid=(B, depth)
        "wqkv": jnp.stack(wqkv), "bqkv": jnp.stack(bqkv),
        "wo": jnp.stack(wo), "bo": jnp.stack(bo),
        "ln1_w": jnp.stack(ln1w), "ln1_b": jnp.stack(ln1b),
        "w1": jnp.stack(w1), "b1": jnp.stack(b1),
        "w2": jnp.stack(w2), "b2": jnp.stack(b2),
        "ln2_w": jnp.stack(ln2w), "ln2_b": jnp.stack(ln2b),
        # char head
        "head_w": pad_to(raw["head_w"], (Dp, Cp)).astype(jnp.bfloat16),
        "head_b": pad_to(raw["head_b"].reshape(1, num_class), (1, Cp)),
    }
    return params, raw


# ----------------------------------------------------------------------------
# Predator forward
# ----------------------------------------------------------------------------
def predator_forward(x, params, *, embed_dim, num_heads, num_class,
                     batch_max_length, patch_size):
    B, C, Hh, Ww = x.shape
    ph, pw = patch_size
    GH, GW = Hh // ph, Ww // pw
    P = GH * GW
    L = batch_max_length
    hd = embed_dim // num_heads

    # im2col matching Conv2d(stride=patch) + flatten(2).transpose(1, 2),
    # with the contraction dim zero-padded to a lane multiple.
    Cpp = C * ph * pw
    Cpp_pad = _round_up(Cpp, _LANE)
    patches = (x.reshape(B, C, GH, ph, GW, pw)
                 .transpose(0, 2, 4, 1, 3, 5)
                 .reshape(B, P, Cpp))
    patches = jnp.pad(patches, ((0, 0), (0, 0), (0, Cpp_pad - Cpp))).astype(jnp.bfloat16)

    tokens = embed_tokens(patches, params)                     # (B, T, Dp) f32
    logits_pad = transformer(tokens, params, d_real=embed_dim,
                             head_dim_real=hd, num_heads=num_heads,
                             num_chars=L)                      # (B, q_rows_pad, Cp)
    q_rows_pad = logits_pad.shape[1]
    # Char tokens are the last L rows of the query window; real classes first.
    return logits_pad[:, q_rows_pad - L:, :num_class]


# ----------------------------------------------------------------------------
# Pure-JAX reference (PyTorch semantics: char tokens first, eval-mode dropout)
# ----------------------------------------------------------------------------
def reference_forward(x, raw, cfg):
    B, C, Hh, Ww = x.shape
    ph, pw = cfg["patch_size"]
    GH, GW = Hh // ph, Ww // pw
    P = GH * GW
    D = cfg["embed_dim"]
    Hn = cfg["num_heads"]
    hd = D // Hn
    L = cfg["batch_max_length"]

    patches = (x.reshape(B, C, GH, ph, GW, pw)
                 .transpose(0, 2, 4, 1, 3, 5)
                 .reshape(B, P, C * ph * pw))
    emb = patches @ raw["patch_w"] + raw["patch_b"]
    tok = jnp.concatenate(
        [jnp.broadcast_to(raw["char_tokens"][None], (B, L, D)), emb], axis=1)
    tok = tok + raw["pos_embed"][None]

    def ln(v):
        m = v.mean(-1, keepdims=True)
        var = ((v - m) ** 2).mean(-1, keepdims=True)
        return (v - m) / jnp.sqrt(var + 1e-5)

    for blk in raw["blocks"]:
        q = tok @ blk["wq_t"] + blk["bq"]
        k = tok @ blk["wk_t"] + blk["bk"]
        v = tok @ blk["wv_t"] + blk["bv"]
        qh = q.reshape(B, -1, Hn, hd).transpose(0, 2, 1, 3)
        kh = k.reshape(B, -1, Hn, hd).transpose(0, 2, 1, 3)
        vh = v.reshape(B, -1, Hn, hd).transpose(0, 2, 1, 3)
        s = jnp.einsum("bhqd,bhkd->bhqk", qh, kh) / math.sqrt(hd)
        p = jax.nn.softmax(s, axis=-1)
        o = jnp.einsum("bhqk,bhkd->bhqd", p, vh).transpose(0, 2, 1, 3).reshape(B, -1, D)
        attn = o @ blk["wo_t"] + blk["bo"]
        h1 = ln(tok + attn)
        ffn = jnp.maximum(h1 @ blk["w1_t"] + blk["b1"], 0.0) @ blk["w2_t"] + blk["b2"]
        tok = ln(h1 + ffn)

    chars = tok[:, :L, :]
    return chars @ raw["head_w"] + raw["head_b"]


# ----------------------------------------------------------------------------
if __name__ == "__main__":
    cfg = dict(
        in_chans=3,
        embed_dim=32,
        num_heads=4,
        depth=2,
        num_class=16,
        batch_max_length=5,
        mlp_ratio=4,
        patch_size=(4, 4),
        img_size=(8, 16),
    )
    B = 2

    key = jax.random.PRNGKey(0)
    k_x, k_p = jax.random.split(key)
    x = jax.random.normal(k_x, (B, cfg["in_chans"], *cfg["img_size"]), jnp.float32)
    params, raw = init_params(k_p, **cfg)

    fwd = jax.jit(functools.partial(
        predator_forward,
        embed_dim=cfg["embed_dim"],
        num_heads=cfg["num_heads"],
        num_class=cfg["num_class"],
        batch_max_length=cfg["batch_max_length"],
        patch_size=cfg["patch_size"],
    ))
    out = fwd(x, params)
    jax.block_until_ready(out)

    expected_shape = (B, cfg["batch_max_length"], cfg["num_class"])
    assert out.shape == expected_shape, (out.shape, expected_shape)
    assert bool(jnp.all(jnp.isfinite(out)))

    ref = reference_forward(x, raw, cfg)
    max_err = float(jnp.max(jnp.abs(out - ref)))
    assert max_err < 5e-2, f"max abs error vs reference: {max_err}"
    print("KERNEL_OK")
</pallas_src>

<mosaic_0001>
module attributes {stable_mosaic.version = 11 : i64} {
  func.func @kernel(%arg0: i32, %arg1: memref<1x8x128xbf16, #tpu.memory_space<vmem>>, %arg2: memref<128x128xbf16, #tpu.memory_space<vmem>>, %arg3: memref<8x128xf32, #tpu.memory_space<vmem>>, %arg4: memref<5x128xf32, #tpu.memory_space<vmem>>, %arg5: memref<1x13x128xf32, #tpu.memory_space<vmem>>) attributes {dimension_semantics = [#tpu.dimension_semantics<parallel>], iteration_bounds = array<i64: 2>, scalar_prefetch = 0 : i64, scratch_operands = 0 : i64, tpu.core_type = #tpu.core_type<tc>, window_params = [{transform_indices = @transform_0, window_bounds = array<i64: 1, 8, 128>}, {pipeline_mode = #tpu.pipeline_mode<synchronous>, transform_indices = @transform_1, window_bounds = array<i64: 128, 128>}, {pipeline_mode = #tpu.pipeline_mode<synchronous>, transform_indices = @transform_2, window_bounds = array<i64: 8, 128>}, {pipeline_mode = #tpu.pipeline_mode<synchronous>, transform_indices = @transform_3, window_bounds = array<i64: 5, 128>}, {transform_indices = @transform_4, window_bounds = array<i64: 1, 13, 128>}]} {
    %c0 = arith.constant 0 : index
    %c0_0 = arith.constant 0 : index
    %c0_1 = arith.constant 0 : index
    %0 = vector.load %arg1[%c0, %c0_0, %c0_1] : memref<1x8x128xbf16, #tpu.memory_space<vmem>>, vector<1x8x128xbf16>
    %1 = vector.shape_cast %0 : vector<1x8x128xbf16> to vector<8x128xbf16>
    %c0_2 = arith.constant 0 : index
    %c0_3 = arith.constant 0 : index
    %2 = vector.load %arg2[%c0_2, %c0_3] : memref<128x128xbf16, #tpu.memory_space<vmem>>, vector<128x128xbf16>
    %cst = arith.constant dense<0.000000e+00> : vector<8x128xf32>
    %3 = tpu.matmul %1, %2, %cst {dimension_numbers = #tpu.dot_dimension_numbers<[1], [0], [0], [1], [0, 0, 1, 1], [], []>} : vector<8x128xbf16>, vector<128x128xbf16>, vector<8x128xf32> -> vector<8x128xf32>
    %c0_4 = arith.constant 0 : index
    %c0_5 = arith.constant 0 : index
    %4 = vector.load %arg3[%c0_4, %c0_5] : memref<8x128xf32, #tpu.memory_space<vmem>>, vector<8x128xf32>
    %5 = arith.addf %3, %4 : vector<8x128xf32>
    %c0_6 = arith.constant 0 : index
    %c0_7 = arith.constant 0 : index
    %c0_8 = arith.constant 0 : index
    %6 = vector.load %arg5[%c0_6, %c0_7, %c0_8] : memref<1x13x128xf32, #tpu.memory_space<vmem>>, vector<1x8x128xf32>
    %7 = vector.shape_cast %6 : vector<1x8x128xf32> to vector<8x128xf32>
    %8 = vector.shape_cast %5 : vector<8x128xf32> to vector<1x8x128xf32>
    tpu.vector_store %arg5[%c0_6, %c0_7, %c0_8], %8 {strides = array<i32>} : memref<1x13x128xf32, #tpu.memory_space<vmem>>, vector<1x8x128xf32>,
    %c0_9 = arith.constant 0 : index
    %c0_10 = arith.constant 0 : index
    %9 = vector.load %arg4[%c0_9, %c0_10] : memref<5x128xf32, #tpu.memory_space<vmem>>, vector<5x128xf32>
    %c0_11 = arith.constant 0 : index
    %c8 = arith.constant 8 : index
    %c0_12 = arith.constant 0 : index
    %10 = vector.load %arg5[%c0_11, %c8, %c0_12] : memref<1x13x128xf32, #tpu.memory_space<vmem>>, vector<1x5x128xf32>
    %11 = vector.shape_cast %10 : vector<1x5x128xf32> to vector<5x128xf32>
    %12 = vector.shape_cast %9 : vector<5x128xf32> to vector<1x5x128xf32>
    tpu.vector_store %arg5[%c0_11, %c8, %c0_12], %12 {strides = array<i32>} : memref<1x13x128xf32, #tpu.memory_space<vmem>>, vector<1x5x128xf32>,
    return
  }
  func.func @transform_0(%arg0: i32) -> (i32, i32, i32) {
    %c0_i32 = arith.constant 0 : i32
    %c0_i32_0 = arith.constant 0 : i32
    %c0_i32_1 = arith.constant 0 : i32
    return %arg0, %c0_i32, %c0_i32_0 : i32, i32, i32
  }
  func.func @transform_1(%arg0: i32) -> (i32, i32) {
    %c0_i32 = arith.constant 0 : i32
    %c0_i32_0 = arith.constant 0 : i32
    %c0_i32_1 = arith.constant 0 : i32
    return %c0_i32, %c0_i32_0 : i32, i32
  }
  func.func @transform_2(%arg0: i32) -> (i32, i32) {
    %c0_i32 = arith.constant 0 : i32
    %c0_i32_0 = arith.constant 0 : i32
    %c0_i32_1 = arith.constant 0 : i32
    return %c0_i32, %c0_i32_0 : i32, i32
  }
  func.func @transform_3(%arg0: i32) -> (i32, i32) {
    %c0_i32 = arith.constant 0 : i32
    %c0_i32_0 = arith.constant 0 : i32
    %c0_i32_1 = arith.constant 0 : i32
    return %c0_i32, %c0_i32_0 : i32, i32
  }
  func.func @transform_4(%arg0: i32) -> (i32, i32, i32) {
    %c0_i32 = arith.constant 0 : i32
    %c0_i32_0 = arith.constant 0 : i32
    %c0_i32_1 = arith.constant 0 : i32
    return %arg0, %c0_i32, %c0_i32_0 : i32, i32, i32
  }
}

module attributes {stable_mosaic.version = 11 : i64} {
  func.func @kernel(%arg0: i32, %arg1: i32, %arg2: memref<1x13x128xf32, #tpu.memory_space<vmem>>, %arg3: memref<1x128x384xbf16, #tpu.memory_space<vmem>>, %arg4: memref<1x1x384xf32, #tpu.memory_space<vmem>>, %arg5: memref<1x128x128xbf16, #tpu.memory_space<vmem>>, %arg6: memref<1x1x128xf32, #tpu.memory_space<vmem>>, %arg7: memref<1x1x128xf32, #tpu.memory_space<vmem>>, %arg8: memref<1x1x128xf32, #tpu.memory_space<vmem>>, %arg9: memref<1x128x128xbf16, #tpu.memory_space<vmem>>, %arg10: memref<1x1x128xf32, #tpu.memory_space<vmem>>, %arg11: memref<1x128x128xbf16, #tpu.memory_space<vmem>>, %arg12: memref<1x1x128xf32, #tpu.memory_space<vmem>>, %arg13: memref<1x1x128xf32, #tpu.memory_space<vmem>>, %arg14: memref<1x1x128xf32, #tpu.memory_space<vmem>>, %arg15: memref<128x128xbf16, #tpu.memory_space<vmem>>, %arg16: memref<1x128xf32, #tpu.memory_space<vmem>>, %arg17: memref<1x8x128xf32, #tpu.memory_space<vmem>>, %arg18: memref<13x128xf32, #tpu.memory_space<vmem>>) attributes {dimension_semantics = [#tpu.dimension_semantics<parallel>, #tpu.dimension_semantics<arbitrary>], iteration_bounds = array<i64: 2, 2>, scalar_prefetch = 0 : i64, scratch_operands = 1 : i64, tpu.core_type = #tpu.core_type<tc>, window_params = [{transform_indices = @transform_0, window_bounds = array<i64: 1, 13, 128>}, {transform_indices = @transform_1, window_bounds = array<i64: 1, 128, 384>}, {transform_indices = @transform_2, window_bounds = array<i64: 1, 1, 384>}, {transform_indices = @transform_3, window_bounds = array<i64: 1, 128, 128>}, {transform_indices = @transform_4, window_bounds = array<i64: 1, 1, 128>}, {transform_indices = @transform_5, window_bounds = array<i64: 1, 1, 128>}, {transform_indices = @transform_6, window_bounds = array<i64: 1, 1, 128>}, {transform_indices = @transform_7, window_bounds = array<i64: 1, 128, 128>}, {transform_indices = @transform_8, window_bounds = array<i64: 1, 1, 128>}, {transform_indices = @transform_9, window_bounds = array<i64: 1, 128, 128>}, {transform_indices = @transform_10, window_bounds = array<i64: 1, 1, 128>}, {transform_indices = @transform_11, window_bounds = array<i64: 1, 1, 128>}, {transform_indices = @transform_12, window_bounds = array<i64: 1, 1, 128>}, {pipeline_mode = #tpu.pipeline_mode<synchronous>, transform_indices = @transform_13, window_bounds = array<i64: 128, 128>}, {pipeline_mode = #tpu.pipeline_mode<synchronous>, transform_indices = @transform_14, window_bounds = array<i64: 1, 128>}, {transform_indices = @transform_15, window_bounds = array<i64: 1, 8, 128>}]} {
    %c0_i32 = arith.constant 0 : i32
    %0 = arith.cmpi eq, %arg1, %c0_i32 : i32
    %1 = arith.extui %0 : i1 to i32
    %c0_i32_0 = arith.constant 0 : i32
    %2 = arith.cmpi ne, %1, %c0_i32_0 : i32
    scf.if %2 {
      %c0_75 = arith.constant 0 : index
      %c0_76 = arith.constant 0 : index
      %c0_77 = arith.constant 0 : index
      %186 = vector.load %arg2[%c0_75, %c0_76, %c0_77] : memref<1x13x128xf32, #tpu.memory_space<vmem>>, vector<1x13x128xf32>
      %187 = vector.shape_cast %186 : vector<1x13x128xf32> to vector<13x128xf32>
      %c0_78 = arith.constant 0 : index
      %c0_79 = arith.constant 0 : index
      %188 = vector.load %arg18[%c0_78, %c0_79] : memref<13x128xf32, #tpu.memory_space<vmem>>, vector<13x128xf32>
      tpu.vector_store %arg18[%c0_78, %c0_79], %187 {strides = array<i32>} : memref<13x128xf32, #tpu.memory_space<vmem>>, vector<13x128xf32>,
    } else {
    }
    %c0 = arith.constant 0 : index
    %c0_1 = arith.constant 0 : index
    %3 = vector.load %arg18[%c0, %c0_1] : memref<13x128xf32, #tpu.memory_space<vmem>>, vector<13x128xf32>
    %4 = tpu.iota {dimensions = array<i32: 1>} : vector<1x128xi32>
    %c32_i32 = arith.constant 32 : i32
    %5 = vector.broadcast %c32_i32 : i32 to vector<1x128xi32>
    %6 = arith.cmpi slt, %4, %5 : vector<1x128xi32>
    %7 = arith.extui %6 : vector<1x128xi1> to vector<1x128xi32>
    %8 = arith.sitofp %7 : vector<1x128xi32> to vector<1x128xf32>
    %9 = arith.truncf %3 : vector<13x128xf32> to vector<13x128xbf16>
    %c0_2 = arith.constant 0 : index
    %c0_3 = arith.constant 0 : index
    %c0_4 = arith.constant 0 : index
    %10 = vector.load %arg3[%c0_2, %c0_3, %c0_4] : memref<1x128x384xbf16, #tpu.memory_space<vmem>>, vector<1x128x384xbf16>
    %11 = vector.shape_cast %10 : vector<1x128x384xbf16> to vector<128x384xbf16>
    %cst = arith.constant dense<0.000000e+00> : vector<13x384xf32>
    %12 = tpu.matmul %9, %11, %cst {dimension_numbers = #tpu.dot_dimension_numbers<[1], [0], [0], [1], [0, 0, 1, 1], [], []>} : vector<13x128xbf16>, vector<128x384xbf16>, vector<13x384xf32> -> vector<13x384xf32>
    %c0_5 = arith.constant 0 : index
    %c0_6 = arith.constant 0 : index
    %c0_7 = arith.constant 0 : index
    %13 = vector.load %arg4[%c0_5, %c0_6, %c0_7] : memref<1x1x384xf32, #tpu.memory_space<vmem>>, vector<1x1x384xf32>
    %14 = vector.shape_cast %13 : vector<1x1x384xf32> to vector<1x384xf32>
    %15 = vector.broadcast %14 : vector<1x384xf32> to vector<13x384xf32>
    %16 = arith.addf %12, %15 : vector<13x384xf32>
    %17 = vector.extract_strided_slice %16 {offsets = [0, 0], sizes = [13, 32], strides = [1, 1]} : vector<13x384xf32> to vector<13x32xf32>
    %18 = vector.extract_strided_slice %16 {offsets = [0, 128], sizes = [13, 32], strides = [1, 1]} : vector<13x384xf32> to vector<13x32xf32>
    %19 = vector.extract_strided_slice %16 {offsets = [0, 256], sizes = [13, 32], strides = [1, 1]} : vector<13x384xf32> to vector<13x32xf32>
    %20 = arith.truncf %17 : vector<13x32xf32> to vector<13x32xbf16>
    %21 = arith.truncf %18 : vector<13x32xf32> to vector<13x32xbf16>
    %cst_8 = arith.constant dense<0.000000e+00> : vector<13x13xf32>
    %22 = tpu.matmul %20, %21, %cst_8 {dimension_numbers = #tpu.dot_dimension_numbers<[1], [1], [0], [0], [0, 0, 1, 0], [], []>} : vector<13x32xbf16>, vector<13x32xbf16>, vector<13x13xf32> -> vector<13x13xf32>
    %cst_9 = arith.constant 0.353553385 : f32
    %23 = vector.broadcast %cst_9 : f32 to vector<13x13xf32>
    %24 = arith.mulf %22, %23 : vector<13x13xf32>
    %cst_10 = arith.constant dense<0xFF800000> : vector<13xf32>
    %25 = vector.multi_reduction <maximumf>, %24, %cst_10 [1] : vector<13x13xf32> to vector<13xf32>
    %26 = vector.shape_cast %25 : vector<13xf32> to vector<13x1xf32>
    %27 = vector.broadcast %26 : vector<13x1xf32> to vector<13x13xf32>
    %28 = arith.subf %24, %27 : vector<13x13xf32>
    %29 = math.exp %28 : vector<13x13xf32>
    %cst_11 = arith.constant dense<0.000000e+00> : vector<13xf32>
    %30 = vector.multi_reduction <add>, %29, %cst_11 [1] : vector<13x13xf32> to vector<13xf32>
    %31 = vector.shape_cast %30 : vector<13xf32> to vector<13x1xf32>
    %32 = tpu.reciprocal %31 {approx = true} : vector<13x1xf32> -> vector<13x1xf32>
    %33 = vector.broadcast %32 : vector<13x1xf32> to vector<13x13xf32>
    %34 = arith.mulf %29, %33 : vector<13x13xf32>
    %35 = arith.truncf %34 : vector<13x13xf32> to vector<13x13xbf16>
    %36 = arith.truncf %19 : vector<13x32xf32> to vector<13x32xbf16>
    %cst_12 = arith.constant dense<0.000000e+00> : vector<13x32xf32>
    %37 = tpu.matmul %35, %36, %cst_12 {dimension_numbers = #tpu.dot_dimension_numbers<[1], [0], [0], [1], [0, 0, 1, 1], [], []>} : vector<13x13xbf16>, vector<13x32xbf16>, vector<13x32xf32> -> vector<13x32xf32>
    %38 = vector.extract_strided_slice %16 {offsets = [0, 32], sizes = [13, 32], strides = [1, 1]} : vector<13x384xf32> to vector<13x32xf32>
    %39 = vector.extract_strided_slice %16 {offsets = [0, 160], sizes = [13, 32], strides = [1, 1]} : vector<13x384xf32> to vector<13x32xf32>
    %40 = vector.extract_strided_slice %16 {offsets = [0, 288], sizes = [13, 32], strides = [1, 1]} : vector<13x384xf32> to vector<13x32xf32>
    %41 = arith.truncf %38 : vector<13x32xf32> to vector<13x32xbf16>
    %42 = arith.truncf %39 : vector<13x32xf32> to vector<13x32xbf16>
    %cst_13 = arith.constant dense<0.000000e+00> : vector<13x13xf32>
    %43 = tpu.matmul %41, %42, %cst_13 {dimension_numbers = #tpu.dot_dimension_numbers<[1], [1], [0], [0], [0, 0, 1, 0], [], []>} : vector<13x32xbf16>, vector<13x32xbf16>, vector<13x13xf32> -> vector<13x13xf32>
    %cst_14 = arith.constant 0.353553385 : f32
    %44 = vector.broadcast %cst_14 : f32 to vector<13x13xf32>
    %45 = arith.mulf %43, %44 : vector<13x13xf32>
    %cst_15 = arith.constant dense<0xFF800000> : vector<13xf32>
    %46 = vector.multi_reduction <maximumf>, %45, %cst_15 [1] : vector<13x13xf32> to vector<13xf32>
    %47 = vector.shape_cast %46 : vector<13xf32> to vector<13x1xf32>
    %48 = vector.broadcast %47 : vector<13x1xf32> to vector<13x13xf32>
    %49 = arith.subf %45, %48 : vector<13x13xf32>
    %50 = math.exp %49 : vector<13x13xf32>
    %cst_16 = arith.constant dense<0.000000e+00> : vector<13xf32>
    %51 = vector.multi_reduction <add>, %50, %cst_16 [1] : vector<13x13xf32> to vector<13xf32>
    %52 = vector.shape_cast %51 : vector<13xf32> to vector<13x1xf32>
    %53 = tpu.reciprocal %52 {approx = true} : vector<13x1xf32> -> vector<13x1xf32>
    %54 = vector.broadcast %53 : vector<13x1xf32> to vector<13x13xf32>
    %55 = arith.mulf %50, %54 : vector<13x13xf32>
    %56 = arith.truncf %55 : vector<13x13xf32> to vector<13x13xbf16>
    %57 = arith.truncf %40 : vector<13x32xf32> to vector<13x32xbf16>
    %cst_17 = arith.constant dense<0.000000e+00> : vector<13x32xf32>
    %58 = tpu.matmul %56, %57, %cst_17 {dimension_numbers = #tpu.dot_dimension_numbers<[1], [0], [0], [1], [0, 0, 1, 1], [], []>} : vector<13x13xbf16>, vector<13x32xbf16>, vector<13x32xf32> -> vector<13x32xf32>
    %59 = vector.extract_strided_slice %16 {offsets = [0, 64], sizes = [13, 32], strides = [1, 1]} : vector<13x384xf32> to vector<13x32xf32>
    %60 = vector.extract_strided_slice %16 {offsets = [0, 192], sizes = [13, 32], strides = [1, 1]} : vector<13x384xf32> to vector<13x32xf32>
    %61 = vector.extract_strided_slice %16 {offsets = [0, 320], sizes = [13, 32], strides = [1, 1]} : vector<13x384xf32> to vector<13x32xf32>
    %62 = arith.truncf %59 : vector<13x32xf32> to vector<13x32xbf16>
    %63 = arith.truncf %60 : vector<13x32xf32> to vector<13x32xbf16>
    %cst_18 = arith.constant dense<0.000000e+00> : vector<13x13xf32>
    %64 = tpu.matmul %62, %63, %cst_18 {dimension_numbers = #tpu.dot_dimension_numbers<[1], [1], [0], [0], [0, 0, 1, 0], [], []>} : vector<13x32xbf16>, vector<13x32xbf16>, vector<13x13xf32> -> vector<13x13xf32>
    %cst_19 = arith.constant 0.353553385 : f32
    %65 = vector.broadcast %cst_19 : f32 to vector<13x13xf32>
    %66 = arith.mulf %64, %65 : vector<13x13xf32>
    %cst_20 = arith.constant dense<0xFF800000> : vector<13xf32>
    %67 = vector.multi_reduction <maximumf>, %66, %cst_20 [1] : vector<13x13xf32> to vector<13xf32>
    %68 = vector.shape_cast %67 : vector<13xf32> to vector<13x1xf32>
    %69 = vector.broadcast %68 : vector<13x1xf32> to vector<13x13xf32>
    %70 = arith.subf %66, %69 : vector<13x13xf32>
    %71 = math.exp %70 : vector<13x13xf32>
    %cst_21 = arith.constant dense<0.000000e+00> : vector<13xf32>
    %72 = vector.multi_reduction <add>, %71, %cst_21 [1] : vector<13x13xf32> to vector<13xf32>
    %73 = vector.shape_cast %72 : vector<13xf32> to vector<13x1xf32>
    %74 = tpu.reciprocal %73 {approx = true} : vector<13x1xf32> -> vector<13x1xf32>
    %75 = vector.broadcast %74 : vector<13x1xf32> to vector<13x13xf32>
    %76 = arith.mulf %71, %75 : vector<13x13xf32>
    %77 = arith.truncf %76 : vector<13x13xf32> to vector<13x13xbf16>
    %78 = arith.truncf %61 : vector<13x32xf32> to vector<13x32xbf16>
    %cst_22 = arith.constant dense<0.000000e+00> : vector<13x32xf32>
    %79 = tpu.matmul %77, %78, %cst_22 {dimension_numbers = #tpu.dot_dimension_numbers<[1], [0], [0], [1], [0, 0, 1, 1], [], []>} : vector<13x13xbf16>, vector<13x32xbf16>, vector<13x32xf32> -> vector<13x32xf32>
    %80 = vector.extract_strided_slice %16 {offsets = [0, 96], sizes = [13, 32], strides = [1, 1]} : vector<13x384xf32> to vector<13x32xf32>
    %81 = vector.extract_strided_slice %16 {offsets = [0, 224], sizes = [13, 32], strides = [1, 1]} : vector<13x384xf32> to vector<13x32xf32>
    %82 = vector.extract_strided_slice %16 {offsets = [0, 352], sizes = [13, 32], strides = [1, 1]} : vector<13x384xf32> to vector<13x32xf32>
    %83 = arith.truncf %80 : vector<13x32xf32> to vector<13x32xbf16>
    %84 = arith.truncf %81 : vector<13x32xf32> to vector<13x32xbf16>
    %cst_23 = arith.constant dense<0.000000e+00> : vector<13x13xf32>
    %85 = tpu.matmul %83, %84, %cst_23 {dimension_numbers = #tpu.dot_dimension_numbers<[1], [1], [0], [0], [0, 0, 1, 0], [], []>} : vector<13x32xbf16>, vector<13x32xbf16>, vector<13x13xf32> -> vector<13x13xf32>
    %cst_24 = arith.constant 0.353553385 : f32
    %86 = vector.broadcast %cst_24 : f32 to vector<13x13xf32>
    %87 = arith.mulf %85, %86 : vector<13x13xf32>
    %cst_25 = arith.constant dense<0xFF800000> : vector<13xf32>
    %88 = vector.multi_reduction <maximumf>, %87, %cst_25 [1] : vector<13x13xf32> to vector<13xf32>
    %89 = vector.shape_cast %88 : vector<13xf32> to vector<13x1xf32>
    %90 = vector.broadcast %89 : vector<13x1xf32> to vector<13x13xf32>
    %91 = arith.subf %87, %90 : vector<13x13xf32>
    %92 = math.exp %91 : vector<13x13xf32>
    %cst_26 = arith.constant dense<0.000000e+00> : vector<13xf32>
    %93 = vector.multi_reduction <add>, %92, %cst_26 [1] : vector<13x13xf32> to vector<13xf32>
    %94 = vector.shape_cast %93 : vector<13xf32> to vector<13x1xf32>
    %95 = tpu.reciprocal %94 {approx = true} : vector<13x1xf32> -> vector<13x1xf32>
    %96 = vector.broadcast %95 : vector<13x1xf32> to vector<13x13xf32>
    %97 = arith.mulf %92, %96 : vector<13x13xf32>
    %98 = arith.truncf %97 : vector<13x13xf32> to vector<13x13xbf16>
    %99 = arith.truncf %82 : vector<13x32xf32> to vector<13x32xbf16>
    %cst_27 = arith.constant dense<0.000000e+00> : vector<13x32xf32>
    %100 = tpu.matmul %98, %99, %cst_27 {dimension_numbers = #tpu.dot_dimension_numbers<[1], [0], [0], [1], [0, 0, 1, 1], [], []>} : vector<13x13xbf16>, vector<13x32xbf16>, vector<13x32xf32> -> vector<13x32xf32>
    %101 = tpu.concatenate %37, %58, %79, %100 in 1 : vector<13x32xf32>, vector<13x32xf32>, vector<13x32xf32>, vector<13x32xf32> -> vector<13x128xf32>
    %102 = arith.truncf %101 : vector<13x128xf32> to vector<13x128xbf16>
    %c0_28 = arith.constant 0 : index
    %c0_29 = arith.constant 0 : index
    %c0_30 = arith.constant 0 : index
    %103 = vector.load %arg5[%c0_28, %c0_29, %c0_30] : memref<1x128x128xbf16, #tpu.memory_space<vmem>>, vector<1x128x128xbf16>
    %104 = vector.shape_cast %103 : vector<1x128x128xbf16> to vector<128x128xbf16>
    %cst_31 = arith.constant dense<0.000000e+00> : vector<13x128xf32>
    %105 = tpu.matmul %102, %104, %cst_31 {dimension_numbers = #tpu.dot_dimension_numbers<[1], [0], [0], [1], [0, 0, 1, 1], [], []>} : vector<13x128xbf16>, vector<128x128xbf16>, vector<13x128xf32> -> vector<13x128xf32>
    %c0_32 = arith.constant 0 : index
    %c0_33 = arith.constant 0 : index
    %c0_34 = arith.constant 0 : index
    %106 = vector.load %arg6[%c0_32, %c0_33, %c0_34] : memref<1x1x128xf32, #tpu.memory_space<vmem>>, vector<1x1x128xf32>
    %107 = vector.shape_cast %106 : vector<1x1x128xf32> to vector<1x128xf32>
    %108 = vector.broadcast %107 : vector<1x128xf32> to vector<13x128xf32>
    %109 = arith.addf %105, %108 : vector<13x128xf32>
    %110 = arith.addf %3, %109 : vector<13x128xf32>
    %c0_35 = arith.constant 0 : index
    %c0_36 = arith.constant 0 : index
    %c0_37 = arith.constant 0 : index
    %111 = vector.load %arg7[%c0_35, %c0_36, %c0_37] : memref<1x1x128xf32, #tpu.memory_space<vmem>>, vector<1x1x128xf32>
    %112 = vector.shape_cast %111 : vector<1x1x128xf32> to vector<1x128xf32>
    %c0_38 = arith.constant 0 : index
    %c0_39 = arith.constant 0 : index
    %c0_40 = arith.constant 0 : index
    %113 = vector.load %arg8[%c0_38, %c0_39, %c0_40] : memref<1x1x128xf32, #tpu.memory_space<vmem>>, vector<1x1x128xf32>
    %114 = vector.shape_cast %113 : vector<1x1x128xf32> to vector<1x128xf32>
    %cst_41 = arith.constant dense<0.000000e+00> : vector<13xf32>
    %115 = vector.multi_reduction <add>, %110, %cst_41 [1] : vector<13x128xf32> to vector<13xf32>
    %116 = vector.shape_cast %115 : vector<13xf32> to vector<13x1xf32>
    %cst_42 = arith.constant 3.125000e-02 : f32
    %117 = vector.broadcast %cst_42 : f32 to vector<13x1xf32>
    %118 = arith.mulf %116, %117 : vector<13x1xf32>
    %119 = vector.broadcast %118 : vector<13x1xf32> to vector<13x128xf32>
    %120 = arith.subf %110, %119 : vector<13x128xf32>
    %121 = vector.broadcast %8 : vector<1x128xf32> to vector<13x128xf32>
    %122 = arith.mulf %120, %121 : vector<13x128xf32>
    %123 = arith.mulf %122, %122 : vector<13x128xf32>
    %cst_43 = arith.constant dense<0.000000e+00> : vector<13xf32>
    %124 = vector.multi_reduction <add>, %123, %cst_43 [1] : vector<13x128xf32> to vector<13xf32>
    %125 = vector.shape_cast %124 : vector<13xf32> to vector<13x1xf32>
    %cst_44 = arith.constant 3.125000e-02 : f32
    %126 = vector.broadcast %cst_44 : f32 to vector<13x1xf32>
    %127 = arith.mulf %125, %126 : vector<13x1xf32>
    %cst_45 = arith.constant 9.99999974E-6 : f32
    %128 = vector.broadcast %cst_45 : f32 to vector<13x1xf32>
    %129 = arith.addf %127, %128 : vector<13x1xf32>
    %130 = math.rsqrt %129 : vector<13x1xf32>
    %131 = vector.broadcast %130 : vector<13x1xf32> to vector<13x128xf32>
    %132 = arith.mulf %122, %131 : vector<13x128xf32>
    %133 = vector.broadcast %112 : vector<1x128xf32> to vector<13x128xf32>
    %134 = arith.mulf %132, %133 : vector<13x128xf32>
    %135 = vector.broadcast %114 : vector<1x128xf32> to vector<13x128xf32>
    %136 = arith.addf %134, %135 : vector<13x128xf32>
    %137 = arith.truncf %136 : vector<13x128xf32> to vector<13x128xbf16>
    %c0_46 = arith.constant 0 : index
    %c0_47 = arith.constant 0 : index
    %c0_48 = arith.constant 0 : index
    %138 = vector.load %arg9[%c0_46, %c0_47, %c0_48] : memref<1x128x128xbf16, #tpu.memory_space<vmem>>, vector<1x128x128xbf16>
    %139 = vector.shape_cast %138 : vector<1x128x128xbf16> to vector<128x128xbf16>
    %cst_49 = arith.constant dense<0.000000e+00> : vector<13x128xf32>
    %140 = tpu.matmul %137, %139, %cst_49 {dimension_numbers = #tpu.dot_dimension_numbers<[1], [0], [0], [1], [0, 0, 1, 1], [], []>} : vector<13x128xbf16>, vector<128x128xbf16>, vector<13x128xf32> -> vector<13x128xf32>
    %c0_50 = arith.constant 0 : index
    %c0_51 = arith.constant 0 : index
    %c0_52 = arith.constant 0 : index
    %141 = vector.load %arg10[%c0_50, %c0_51, %c0_52] : memref<1x1x128xf32, #tpu.memory_space<vmem>>, vector<1x1x128xf32>
    %142 = vector.shape_cast %141 : vector<1x1x128xf32> to vector<1x128xf32>
    %143 = vector.broadcast %142 : vector<1x128xf32> to vector<13x128xf32>
    %144 = arith.addf %140, %143 : vector<13x128xf32>
    %cst_53 = arith.constant 0.000000e+00 : f32
    %145 = vector.broadcast %cst_53 : f32 to vector<13x128xf32>
    %146 = arith.maximumf %144, %145 : vector<13x128xf32>
    %147 = arith.truncf %146 : vector<13x128xf32> to vector<13x128xbf16>
    %c0_54 = arith.constant 0 : index
    %c0_55 = arith.constant 0 : index
    %c0_56 = arith.constant 0 : index
    %148 = vector.load %arg11[%c0_54, %c0_55, %c0_56] : memref<1x128x128xbf16, #tpu.memory_space<vmem>>, vector<1x128x128xbf16>
    %149 = vector.shape_cast %148 : vector<1x128x128xbf16> to vector<128x128xbf16>
    %cst_57 = arith.constant dense<0.000000e+00> : vector<13x128xf32>
    %150 = tpu.matmul %147, %149, %cst_57 {dimension_numbers = #tpu.dot_dimension_numbers<[1], [0], [0], [1], [0, 0, 1, 1], [], []>} : vector<13x128xbf16>, vector<128x128xbf16>, vector<13x128xf32> -> vector<13x128xf32>
    %c0_58 = arith.constant 0 : index
    %c0_59 = arith.constant 0 : index
    %c0_60 = arith.constant 0 : index
    %151 = vector.load %arg12[%c0_58, %c0_59, %c0_60] : memref<1x1x128xf32, #tpu.memory_space<vmem>>, vector<1x1x128xf32>
    %152 = vector.shape_cast %151 : vector<1x1x128xf32> to vector<1x128xf32>
    %153 = vector.broadcast %152 : vector<1x128xf32> to vector<13x128xf32>
    %154 = arith.addf %150, %153 : vector<13x128xf32>
    %155 = arith.addf %136, %154 : vector<13x128xf32>
    %c0_61 = arith.constant 0 : index
    %c0_62 = arith.constant 0 : index
    %c0_63 = arith.constant 0 : index
    %156 = vector.load %arg13[%c0_61, %c0_62, %c0_63] : memref<1x1x128xf32, #tpu.memory_space<vmem>>, vector<1x1x128xf32>
    %157 = vector.shape_cast %156 : vector<1x1x128xf32> to vector<1x128xf32>
    %c0_64 = arith.constant 0 : index
    %c0_65 = arith.constant 0 : index
    %c0_66 = arith.constant 0 : index
    %158 = vector.load %arg14[%c0_64, %c0_65, %c0_66] : memref<1x1x128xf32, #tpu.memory_space<vmem>>, vector<1x1x128xf32>
    %159 = vector.shape_cast %158 : vector<1x1x128xf32> to vector<1x128xf32>
    %cst_67 = arith.constant dense<0.000000e+00> : vector<13xf32>
    %160 = vector.multi_reduction <add>, %155, %cst_67 [1] : vector<13x128xf32> to vector<13xf32>
    %161 = vector.shape_cast %160 : vector<13xf32> to vector<13x1xf32>
    %cst_68 = arith.constant 3.125000e-02 : f32
    %162 = vector.broadcast %cst_68 : f32 to vector<13x1xf32>
    %163 = arith.mulf %161, %162 : vector<13x1xf32>
    %164 = vector.broadcast %163 : vector<13x1xf32> to vector<13x128xf32>
    %165 = arith.subf %155, %164 : vector<13x128xf32>
    %166 = vector.broadcast %8 : vector<1x128xf32> to vector<13x128xf32>
    %167 = arith.mulf %165, %166 : vector<13x128xf32>
    %168 = arith.mulf %167, %167 : vector<13x128xf32>
    %cst_69 = arith.constant dense<0.000000e+00> : vector<13xf32>
    %169 = vector.multi_reduction <add>, %168, %cst_69 [1] : vector<13x128xf32> to vector<13xf32>
    %170 = vector.shape_cast %169 : vector<13xf32> to vector<13x1xf32>
    %cst_70 = arith.constant 3.125000e-02 : f32
    %171 = vector.broadcast %cst_70 : f32 to vector<13x1xf32>
    %172 = arith.mulf %170, %171 : vector<13x1xf32>
    %cst_71 = arith.constant 9.99999974E-6 : f32
    %173 = vector.broadcast %cst_71 : f32 to vector<13x1xf32>
    %174 = arith.addf %172, %173 : vector<13x1xf32>
    %175 = math.rsqrt %174 : vector<13x1xf32>
    %176 = vector.broadcast %175 : vector<13x1xf32> to vector<13x128xf32>
    %177 = arith.mulf %167, %176 : vector<13x128xf32>
    %178 = vector.broadcast %157 : vector<1x128xf32> to vector<13x128xf32>
    %179 = arith.mulf %177, %178 : vector<13x128xf32>
    %180 = vector.broadcast %159 : vector<1x128xf32> to vector<13x128xf32>
    %181 = arith.addf %179, %180 : vector<13x128xf32>
    %c0_72 = arith.constant 0 : index
    %c0_73 = arith.constant 0 : index
    %182 = vector.load %arg18[%c0_72, %c0_73] : memref<13x128xf32, #tpu.memory_space<vmem>>, vector<13x128xf32>
    tpu.vector_store %arg18[%c0_72, %c0_73], %181 {strides = array<i32>} : memref<13x128xf32, #tpu.memory_space<vmem>>, vector<13x128xf32>,
    %c1_i32 = arith.constant 1 : i32
    %183 = arith.cmpi eq, %arg1, %c1_i32 : i32
    %184 = arith.extui %183 : i1 to i32
    %c0_i32_74 = arith.constant 0 : i32
    %185 = arith.cmpi ne, %184, %c0_i32_74 : i32
    scf.if %185 {
      %186 = vector.extract_strided_slice %181 {offsets = [5, 0], sizes = [8, 128], strides = [1, 1]} : vector<13x128xf32> to vector<8x128xf32>
      %187 = arith.truncf %186 : vector<8x128xf32> to vector<8x128xbf16>
      %c0_75 = arith.constant 0 : index
      %c0_76 = arith.constant 0 : index
      %188 = vector.load %arg15[%c0_75, %c0_76] : memref<128x128xbf16, #tpu.memory_space<vmem>>, vector<128x128xbf16>
      %cst_77 = arith.constant dense<0.000000e+00> : vector<8x128xf32>
      %189 = tpu.matmul %187, %188, %cst_77 {dimension_numbers = #tpu.dot_dimension_numbers<[1], [0], [0], [1], [0, 0, 1, 1], [], []>} : vector<8x128xbf16>, vector<128x128xbf16>, vector<8x128xf32> -> vector<8x128xf32>
      %c0_78 = arith.constant 0 : index
      %c0_79 = arith.constant 0 : index
      %190 = vector.load %arg16[%c0_78, %c0_79] : memref<1x128xf32, #tpu.memory_space<vmem>>, vector<1x128xf32>
      %191 = vector.broadcast %190 : vector<1x128xf32> to vector<8x128xf32>
      %192 = arith.addf %189, %191 : vector<8x128xf32>
      %c0_80 = arith.constant 0 : index
      %c0_81 = arith.constant 0 : index
      %c0_82 = arith.constant 0 : index
      %193 = vector.load %arg17[%c0_80, %c0_81, %c0_82] : memref<1x8x128xf32, #tpu.memory_space<vmem>>, vector<1x8x128xf32>
      %194 = vector.shape_cast %193 : vector<1x8x128xf32> to vector<8x128xf32>
      %195 = vector.shape_cast %192 : vector<8x128xf32> to vector<1x8x128xf32>
      tpu.vector_store %arg17[%c0_80, %c0_81, %c0_82], %195 {strides = array<i32>} : memref<1x8x128xf32, #tpu.memory_space<vmem>>, vector<1x8x128xf32>,
    } else {
    }
    return
  }
  func.func @transform_0(%arg0: i32, %arg1: i32) -> (i32, i32, i32) {
    %c0_i32 = arith.constant 0 : i32
    %c0_i32_0 = arith.constant 0 : i32
    %c0_i32_1 = arith.constant 0 : i32
    return %arg0, %c0_i32, %c0_i32_0 : i32, i32, i32
  }
  func.func @transform_1(%arg0: i32, %arg1: i32) -> (i32, i32, i32) {
    %c0_i32 = arith.constant 0 : i32
    %c0_i32_0 = arith.constant 0 : i32
    %c0_i32_1 = arith.constant 0 : i32
    return %arg1, %c0_i32, %c0_i32_0 : i32, i32, i32
  }
  func.func @transform_2(%arg0: i32, %arg1: i32) -> (i32, i32, i32) {
    %c0_i32 = arith.constant 0 : i32
    %c0_i32_0 = arith.constant 0 : i32
    %c0_i32_1 = arith.constant 0 : i32
    return %arg1, %c0_i32, %c0_i32_0 : i32, i32, i32
  }
  func.func @transform_3(%arg0: i32, %arg1: i32) -> (i32, i32, i32) {
    %c0_i32 = arith.constant 0 : i32
    %c0_i32_0 = arith.constant 0 : i32
    %c0_i32_1 = arith.constant 0 : i32
    return %arg1, %c0_i32, %c0_i32_0 : i32, i32, i32
  }
  func.func @transform_4(%arg0: i32, %arg1: i32) -> (i32, i32, i32) {
    %c0_i32 = arith.constant 0 : i32
    %c0_i32_0 = arith.constant 0 : i32
    %c0_i32_1 = arith.constant 0 : i32
    return %arg1, %c0_i32, %c0_i32_0 : i32, i32, i32
  }
  func.func @transform_5(%arg0: i32, %arg1: i32) -> (i32, i32, i32) {
    %c0_i32 = arith.constant 0 : i32
    %c0_i32_0 = arith.constant 0 : i32
    %c0_i32_1 = arith.constant 0 : i32
    return %arg1, %c0_i32, %c0_i32_0 : i32, i32, i32
  }
  func.func @transform_6(%arg0: i32, %arg1: i32) -> (i32, i32, i32) {
    %c0_i32 = arith.constant 0 : i32
    %c0_i32_0 = arith.constant 0 : i32
    %c0_i32_1 = arith.constant 0 : i32
    return %arg1, %c0_i32, %c0_i32_0 : i32, i32, i32
  }
  func.func @transform_7(%arg0: i32, %arg1: i32) -> (i32, i32, i32) {
    %c0_i32 = arith.constant 0 : i32
    %c0_i32_0 = arith.constant 0 : i32
    %c0_i32_1 = arith.constant 0 : i32
    return %arg1, %c0_i32, %c0_i32_0 : i32, i32, i32
  }
  func.func @transform_8(%arg0: i32, %arg1: i32) -> (i32, i32, i32) {
    %c0_i32 = arith.constant 0 : i32
    %c0_i32_0 = arith.constant 0 : i32
    %c0_i32_1 = arith.constant 0 : i32
    return %arg1, %c0_i32, %c0_i32_0 : i32, i32, i32
  }
  func.func @transform_9(%arg0: i32, %arg1: i32) -> (i32, i32, i32) {
    %c0_i32 = arith.constant 0 : i32
    %c0_i32_0 = arith.constant 0 : i32
    %c0_i32_1 = arith.constant 0 : i32
    return %arg1, %c0_i32, %c0_i32_0 : i32, i32, i32
  }
  func.func @transform_10(%arg0: i32, %arg1: i32) -> (i32, i32, i32) {
    %c0_i32 = arith.constant 0 : i32
    %c0_i32_0 = arith.constant 0 : i32
    %c0_i32_1 = arith.constant 0 : i32
    return %arg1, %c0_i32, %c0_i32_0 : i32, i32, i32
  }
  func.func @transform_11(%arg0: i32, %arg1: i32) -> (i32, i32, i32) {
    %c0_i32 = arith.constant 0 : i32
    %c0_i32_0 = arith.constant 0 : i32
    %c0_i32_1 = arith.constant 0 : i32
    return %arg1, %c0_i32, %c0_i32_0 : i32, i32, i32
  }
  func.func @transform_12(%arg0: i32, %arg1: i32) -> (i32, i32, i32) {
    %c0_i32 = arith.constant 0 : i32
    %c0_i32_0 = arith.constant 0 : i32
    %c0_i32_1 = arith.constant 0 : i32
    return %arg1, %c0_i32, %c0_i32_0 : i32, i32, i32
  }
  func.func @transform_13(%arg0: i32, %arg1: i32) -> (i32, i32) {
    %c0_i32 = arith.constant 0 : i32
    %c0_i32_0 = arith.constant 0 : i32
    %c0_i32_1 = arith.constant 0 : i32
    return %c0_i32, %c0_i32_0 : i32, i32
  }
  func.func @transform_14(%arg0: i32, %arg1: i32) -> (i32, i32) {
    %c0_i32 = arith.constant 0 : i32
    %c0_i32_0 = arith.constant 0 : i32
    %c0_i32_1 = arith.constant 0 : i32
    return %c0_i32, %c0_i32_0 : i32, i32
  }
  func.func @transform_15(%arg0: i32, %arg1: i32) -> (i32, i32, i32) {
    %c0_i32 = arith.constant 0 : i32
    %c0_i32_0 = arith.constant 0 : i32
    %c0_i32_1 = arith.constant 0 : i32
    return %arg0, %c0_i32, %c0_i32_0 : i32, i32, i32
  }
}

</mosaic_0001>

<bundles_post_ra>
// kernel: predator_forward.2
= control target key start
LH: loop header
LB: loop body
LE: loop exit
PB: predicated region body
PF: predicated region fallthrough
CT: control target
= control target key end

     0   :  { %9 = vsyncpa [#allocation3], 0  ;;  %s538_s15 = smov 0   ;;  %s600_s0 = inlined_call_operand.vmem [shape: bf16[2,8,128], index: 0, kind: input, shape index: {}]   ;;  %s601_s1 = inlined_call_operand.hbm [shape: bf16[128,128], index: 1, kind: input, shape index: {}]   ;;  %s602_s2 = inlined_call_operand.vmem [shape: f32[8,128], index: 2, kind: input, shape index: {}]   ;;  %s603_s3 = inlined_call_operand.vmem [shape: f32[5,128], index: 3, kind: input, shape index: {}]   ;;  %s604_s4 = inlined_call_operand.vmem [shape: f32[2,13,128], index: 4, kind: output, shape index: {}]  }
   0x1 LB: > { %s544_s16 = sadd.s32 4294967295, %s506_s15   ;;  %p389_p0 = scmp.ge.s32.totalorder %s506_s15, 1  ;;  %s506_s15 = sphi %s538_s15, %s15_s15  }
   0x2   : > { %p135_p1 = scmp.lt.s32.totalorder %s506_s15, 3  ;;  %s508_s17 = smov [#allocation2]  }
   0x3   : > { %s147_s18 = sshll.u32 %s508_s17, 4  ;;  %p605_p3 = scmp.eq.s32.totalorder %s544_s16, 0  ;;  %s148_s18 = int_to_ptr.vmem [resolvable:$true] %s147_s18 }
   0x4   : > { %p548_p2 = pnand %p389_p0, %p135_p1  ;;  %s468_s23 = scalar_lea.hbm %s601_s1, 1024 }
   0x5   : > { %p469_p6 = scmp.ne.s32.totalorder %s601_s1, %s468_s23  ;;  %p475_p10 = scmp.lt.u32.totalorder %s468_s23, %s601_s1 }
   0x6   : > { %s607_s19 = scalar_select %p548_p2, 1, 0 }
   0x7   : > { %p441_p4 = pneg %p548_p2 }
   0x9   : > { %p557_p5 = pnand %p605_p3, %p441_p4 }
   0xb   : > { %p470_p7 = pneg %p557_p5 }
   0xd   : > { %p471_p8 = pnand %p470_p7, %p469_p6 }
   0xf   : > { %p472_p9 = pneg %p471_p8 }
  0x11   : > { %p477_p11 = pnand %p475_p10, %p472_p9 }
  0x13   : > { %480 = shalt.err (!%p477_p11)
}
  0x14   : > { %s481_s28 = scalar_lea.vmem %s148_s18, 1024  ;;  %p489_p1 = scmp.lt.s32.totalorder %s148_s18, %s148_s18 }
  0x15   : > { %p482_p12 = scmp.ne.s32.totalorder %s148_s18, %s481_s28  ;;  %p490_p4 = scmp.lt.s32.totalorder %s481_s28, %s481_s28 }
  0x17   : > { %p484_p13 = pnand %p482_p12, %p470_p7  ;;  %p491_p3 = por %p490_p4, %p489_p1 }
  0x19   : > { %p485_p0 = pneg %p484_p13 }
  0x1b   : > { %p492_p2 = pnand %p491_p3, %p485_p0 }
  0x1d   : > { %495 = shalt.err (!%p492_p2)
}
  0x1e   : > { %s509_s29 = smov 64   ;;  %s510_s30 = smov 4  }
  0x1f   : > { %444 = dma.hbm_to_vmem [thread:$0]  (!%p557_p5), %s601_s1, 1024, %s148_s18, [#allocation3], %s509_s29, %s509_s29, %s510_s30  }
  0x20   : > { %p609_p6 = scmp.ne.s32.totalorder %s607_s19, 0 }
  0x21   : > { %p610_p8 = scmp.eq.s32.totalorder (!%p609_p6), %s544_s16, 0 }
  0x22   : > { %176 = sbr.rel (%p609_p6) target bundleno = 290 (0x122), region = 36 }
  0x29   : > { %501 = dma.done.wait (%p610_p8), [#allocation3], 1024   ;;  %p611_p7 = pmov %p610_p8 }
  0x2a   : > { %v511_v0 = vmov 0.0   ;;  %vm512_vm0 = vmmov 0   ;;  %v460_v1 = vld [vmem:[#allocation2] sm:$0xff]   ;;  %v461_v2 = vld [vmem:[#allocation2 + $0x8] sm:$0xff]   ;;  %v462_v3 = vld [vmem:[#allocation2 + $0x10] sm:$0xff]   ;;  %p201_p2 = scmp.lt.s32.totalorder %s544_s16, 1 }
  0x2b   : > { %503 = vsyncadd (%p611_p7), [#allocation3], 4294966272  ;;  %417 = vmatprep.subr.bf16.mxu0 %v511_v0  ;;  %433 = vmatprep.mubr.msk.bf16.mxu0 %vm512_vm0, %v511_v0  ;;  %v463_v4 = vld [vmem:[#allocation2 + $0x18] sm:$0xff]   ;;  %v464_v5 = vld [vmem:[#allocation2 + $0x20] sm:$0xff]  }
  0x2c   : > { %418 = vmatpush3.bf16.msra.mxu0 %v460_v1  ;;  %v465_v6 = vld [vmem:[#allocation2 + $0x28] sm:$0xff]   ;;  %s613_s16 = smov (!%p201_p2, %s544_s16), 1  ;;  %v466_v7 = vld [vmem:[#allocation2 + $0x30] sm:$0xff]   ;;  %v467_v8 = vld [vmem:[#allocation2 + $0x38] sm:$0xff]  }
  0x2d   : > { %419 = vmatprep.subr.bf16.mxu0 %v511_v0  ;;  %s394_s7 = sshll.u32 %s613_s16, 2  ;;  %s407_s11 = sshll.u32 %s613_s16, 4  ;;  %v318_v10 = vld [vmem:[%s603_s3] sm:$0x1f] }
  0x2e   : > { %s204_s10 = scalar_lea.vmem %s600_s0, %s394_s7  ;;  %s209_s14 = scalar_lea.vmem %s604_s4, %s407_s11  ;;  %v228_v11 = vld [vmem:[%s602_s2] sm:$0xff] }
  0x2f   : > { %v211_v9 = vld [vmem:[%s204_s10] sm:$0xf]  ;;  %319 = vst [vmem:[%s209_s14 + $0x8] sm:$0x1f] %v318_v10 }
  0x30   : > { %420 = vmatpush3.bf16.msra.mxu0 %v461_v2 }
  0x31   : > { %421 = vmatprep.subr.bf16.mxu0 %v511_v0 }
  0x34   : > { %422 = vmatpush3.bf16.msra.mxu0 %v462_v3 }
  0x35   : > { %423 = vmatprep.subr.bf16.mxu0 %v511_v0 }
  0x38   : > { %424 = vmatpush3.bf16.msra.mxu0 %v463_v4 }
  0x39   : > { %425 = vmatprep.subr.bf16.mxu0 %v511_v0 }
  0x3c   : > { %426 = vmatpush3.bf16.msra.mxu0 %v464_v5 }
  0x3d   : > { %427 = vmatprep.subr.bf16.mxu0 %v511_v0 }
  0x40   : > { %428 = vmatpush3.bf16.msra.mxu0 %v465_v6 }
  0x41   : > { %429 = vmatprep.subr.bf16.mxu0 %v511_v0 }
  0x44   : > { %430 = vmatpush3.bf16.msra.mxu0 %v466_v7 }
  0x45   : > { %431 = vmatprep.subr.bf16.mxu0 %v511_v0 }
  0x48   : > { %432 = vmatpush3.bf16.msra.mxu0 %v467_v8 }
  0x4b   : > { %434 = vmatmul.mubr.bf16.vlgmr.msra.gmra.mrb[0].mxu0 %v211_v9 }
 0x11e   : > { %v311_v12 = vpop.f32.mrb[0].mxu0 }
 0x11f   : > { %v312_v13 = vadd.f32 %v311_v12, %v228_v11  ;;  %v435_v14 = vpop.f32.mrb[1].mxu0 }
 0x120   : > { %v314_v15 = vpop.f32.mrb[2].mxu0 }
 0x121   : > { %317 = vst [vmem:[%s209_s14] sm:$0xff] %v312_v13  ;;  %v436_v16 = vpop.f32.mrb[3].mxu0 }
 0x122 PF: > { %s15_s15 = sadd.s32 1, %s506_s15  }
 0x123   : > { %p12_p3 = scmp.ge.s32.totalorder %s15_s15, 4  }
 0x125   :  { %14 = sbr.rel (!%p12_p3) target bundleno = 1 (0x1), region = 71 }
 0x12c   :  { %341 = vsyncpa [#allocation3], 1 }
 0x12d   :  { %343 = vsyncpa [#allocation3 + $0x1], 1 }

// kernel: predator_forward.3
= control target key start
LH: loop header
LB: loop body
LE: loop exit
PB: predicated region body
PF: predicated region fallthrough
CT: control target
= control target key end

     0   :  { %s3550_s0 = inlined_call_operand.vmem [shape: f32[2,13,128], index: 0, kind: input, shape index: {}]   ;;  %s3551_s1 = inlined_call_operand.vmem [shape: bf16[2,128,384], index: 1, kind: input, shape index: {}]   ;;  %s3552_s2 = inlined_call_operand.vmem [shape: f32[2,1,384], index: 2, kind: input, shape index: {}]   ;;  %s3553_s3 = inlined_call_operand.vmem [shape: bf16[2,128,128], index: 3, kind: input, shape index: {}]   ;;  %s3554_s4 = inlined_call_operand.vmem [shape: f32[2,1,128], index: 4, kind: input, shape index: {}]   ;;  %s3555_s5 = inlined_call_operand.vmem [shape: f32[2,1,128], index: 5, kind: input, shape index: {}]   ;;  %s3556_s6 = inlined_call_operand.vmem [shape: f32[2,1,128], index: 6, kind: input, shape index: {}]   ;;  %s3557_s7 = inlined_call_operand.vmem [shape: bf16[2,128,128], index: 7, kind: input, shape index: {}]   ;;  %s3558_s8 = inlined_call_operand.vmem [shape: f32[2,1,128], index: 8, kind: input, shape index: {}]   ;;  %s3559_s9 = inlined_call_operand.hbm [shape: bf16[2,128,128], index: 9, kind: input, shape index: {}]   ;;  %s3560_s10 = inlined_call_operand.vmem [shape: f32[2,1,128], index: 10, kind: input, shape index: {}]   ;;  %s3561_s11 = inlined_call_operand.vmem [shape: f32[2,1,128], index: 11, kind: input, shape index: {}]   ;;  %s3562_s12 = inlined_call_operand.vmem [shape: f32[2,1,128], index: 12, kind: input, shape index: {}]   ;;  %s3563_s13 = inlined_call_operand.hbm [shape: bf16[128,128], index: 13, kind: input, shape index: {}]   ;;  %s3564_s14 = inlined_call_operand.vmem [shape: f32[1,128], index: 14, kind: input, shape index: {}]   ;;  %s3565_s15 = inlined_call_operand.vmem [shape: f32[2,8,128], index: 15, kind: output, shape index: {}]  }
   0x1   :  { %3578 = sst [smem:[#allocation17_spill]] %s3550_s0 }
   0x2   :  { %3579 = sst [smem:[#allocation18_spill]] %s3551_s1 }
   0x3   :  { %3580 = sst [smem:[#allocation19_spill]] %s3552_s2 }
   0x4   :  { %3581 = sst [smem:[#allocation20_spill]] %s3553_s3 }
   0x5   :  { %3582 = sst [smem:[#allocation21_spill]] %s3555_s5 }
   0x6   :  { %3583 = sst [smem:[#allocation22_spill]] %s3556_s6 }
   0x7   :  { %3584 = sst [smem:[#allocation23_spill]] %s3559_s9 }
   0x8   :  { %3585 = sst [smem:[#allocation24_spill]] %s3560_s10 }
   0x9   :  { %3586 = sst [smem:[#allocation25_spill]] %s3561_s11 }
   0xa   :  { %3587 = sst [smem:[#allocation26_spill]] %s3562_s12 }
   0xb   :  { %3588 = sst [smem:[#allocation27_spill]] %s3563_s13 }
   0xc   :  { %3589 = sst [smem:[#allocation28_spill]] %s3564_s14 }
   0xd   :  { %3590 = sst [smem:[#allocation29_spill]] %s3565_s15 }
   0xe   :  { %20 = vsyncpa [#allocation4], 0 }
   0xf   :  { %22 = vsyncpa [#allocation4 + $0x1], 0 }
  0x10   :  { %23 = vsyncpa [#allocation6], 0  ;;  %s3069_s18 = smov 0   ;;  %s3071_s19 = smov 0  }
  0x11   :  { %s3073_s20 = smov 0   ;;  %s3075_s21 = smov 0  }
  0x12   :  { %s3077_s22 = smov 0   ;;  %s3079_s23 = smov 0  }
  0x13   :  { %s3081_s24 = smov 0   ;;  %s3083_s25 = smov 0  }
  0x14 LB: > { %3591 = sst [smem:[#allocation9_spill]] %s2950_s19  ;;  %s2323_s26 = sadd.s32 4294967295, %s2974_s25   ;;  %s2974_s25 = sphi %s3083_s25, %s29_s25   ;;  %s2970_s24 = sphi %s3081_s24, %s3637_s24   ;;  %s2966_s23 = sphi %s3079_s23, %s3636_s23   ;;  %s2962_s22 = sphi %s3077_s22, %s3635_s22   ;;  %s2958_s21 = sphi %s3075_s21, %s3634_s21   ;;  %s2954_s20 = sphi %s3073_s20, %s3633_s20   ;;  %s2950_s19 = sphi %s3071_s19, %s3632_s19   ;;  %s2946_s18 = sphi %s3069_s18, %s3631_s18  }
  0x15   : > { %3592 = sst [smem:[#allocation10_spill]] %s2954_s20  ;;  %p295_p0 = scmp.ne.s32.totalorder %s2950_s19, %s2946_s18 }
  0x16   : > { %3593 = sst [smem:[#allocation11_spill]] %s2966_s23  ;;  %p3109_p1 = scmp.eq.s32.totalorder %s2323_s26, 0 }
  0x17   : > { %3594 = sst [smem:[#allocation12_spill]] %s2970_s24  ;;  %p2325_p2 = scmp.ge.s32.totalorder %s2974_s25, 1 }
  0x18   : > { %3595 = sst [smem:[#allocation13_spill]] %s2974_s25  ;;  %p452_p3 = scmp.lt.s32.totalorder %s2974_s25, 5 }
  0x19   : > { %s3596_s27 = scalar_select %p3109_p1, 1, 0 }
  0x1a   : > { %p3117_p4 = por %p3109_p1, %p295_p0  ;;  %p3121_p5 = pnand %p2325_p2, %p452_p3 }
  0x1b   : > { %s2976_s30 = smov [#allocation5]   ;;  %s3600_s13 = sld [smem:[#allocation27_spill]] }
  0x1c   : > { %s3597_s28 = scalar_select %p3117_p4, 1, 0 }
  0x1d   : > { %s3598_s29 = scalar_select %p3121_p5, 1, 0 }
  0x1e   : > { %s464_s16 = sshll.u32 %s2976_s30, 4  ;;  %p2640_p6 = pneg %p3121_p5  ;;  %s465_s16 = int_to_ptr.vmem [resolvable:$true] %s464_s16 }
  0x20   : > { %p3129_p7 = pnand %p2640_p6, %p3109_p1 }
  0x21   : > { %s2846_s14 = scalar_lea.hbm %s3600_s13, 1024 }
  0x22   : > { %p2847_p8 = scmp.ne.s32.totalorder %s3600_s13, %s2846_s14  ;;  %p2848_p9 = pneg %p3129_p7 }
  0x23   : > { %p2853_p12 = scmp.lt.u32.totalorder %s2846_s14, %s3600_s13 }
  0x24   : > { %p2849_p10 = pnand %p2848_p9, %p2847_p8 }
  0x26   : > { %p2850_p11 = pneg %p2849_p10 }
  0x28   : > { %p2855_p13 = pnand %p2853_p12, %p2850_p11 }
  0x2a   : > { %2858 = shalt.err (!%p2855_p13)
}
  0x2b   : > { %s2859_s10 = scalar_lea.vmem %s465_s16, 1024  ;;  %p2867_p6 = scmp.lt.s32.totalorder %s465_s16, %s465_s16 }
  0x2c   : > { %p2860_p0 = scmp.ne.s32.totalorder %s465_s16, %s2859_s10  ;;  %p2868_p1 = scmp.lt.s32.totalorder %s2859_s10, %s2859_s10 }
  0x2e   : > { %p2862_p2 = pnand %p2860_p0, %p2848_p9  ;;  %p2869_p4 = por %p2868_p1, %p2867_p6 }
  0x30   : > { %p2863_p3 = pneg %p2862_p2 }
  0x32   : > { %p2870_p5 = pnand %p2869_p4, %p2863_p3 }
  0x34   : > { %2873 = shalt.err (!%p2870_p5)
}
  0x35   : > { %s3570_s12 = smov 64   ;;  %s3571_s11 = smov 4  }
  0x36   : > { %2643 = dma.hbm_to_vmem [thread:$0]  (!%p3129_p7), %s3600_s13, 1024, %s465_s16, [#allocation6], %s3570_s12, %s3570_s12, %s3571_s11  }
  0x37   : > { %s38_s15 = sadd.s32 1, %s2966_s23  ;;  %s41_s18 = sadd.s32 1, %s2970_s24 }
  0x38   : > { %p39_p1 = scmp.ge.s32.totalorder %s38_s15, 2  ;;  %s282_s26 = sadd.s32 1, %s2954_s20 }
  0x39   : > { %p289_p4 = scmp.ne.s32.totalorder %s2954_s20, %s2950_s19  ;;  %p290_p5 = scmp.eq.s32.totalorder %s2974_s25, 0 }
  0x3a   : > { %s3639_s15 = smov (%p39_p1, %s38_s15), 0  ;;  %s3641_s18 = smov (!%p39_p1, %s41_s18), %s2970_s24 }
  0x3b   : > { %3601 = sst [smem:[#allocation14_spill]] %s3639_s15  ;;  %s279_s17 = ssub.s32 %s2966_s23, %s3639_s15 }
  0x3c   : > { %p43_p8 = scmp.ge.s32.totalorder %s3641_s18, 2  ;;  %p280_p9 = scmp.eq.s32.totalorder %s279_s17, 0 }
  0x3d   : > { %p291_p10 = por %p290_p5, %p289_p4  ;;  %p2649_p11 = scmp.lt.s32.totalorder %s2974_s25, 4 }
  0x3e   : > { %s3643_s18 = smov (%p43_p8, %s3641_s18), 0  ;;  %s544_s30 = sand.u32 1, %s2954_s20  }
  0x3f   : > { %3602 = sst [smem:[#allocation15_spill]] %s3643_s18  ;;  %s2419_s10 = sshll.u32 %s2966_s23, 10 }
  0x40   : > { %s3167_s16 = scalar_select %p280_p9, %s2954_s20, %s282_s26  }
  0x41   : > { %s2328_s14 = sshll.u32 %s544_s30, 6  ;;  %s3604_s9 = sld [smem:[#allocation23_spill]] }
  0x42   : > { %3603 = sst [smem:[#allocation16_spill]] %s3167_s16  ;;  %s548_s15 = scalar_lea.vmem [#allocation3], %s2328_s14 }
  0x43   : > { %s555_s17 = sshll.u32 %s548_s15, 4  ;;  %p3176_p7 = pnand %p2649_p11, %p291_p10  ;;  %s3180_s17 = int_to_ptr.vmem [resolvable:$true] %s555_s17 }
  0x44   : > { %s3182_s26 = scalar_lea.sflag [#allocation4], %s544_s30 }
  0x45   : > { %p2876_p13 = pneg %p3176_p7 }
  0x47   : > { %s3174_s13 = scalar_lea.hbm %s3604_s9, %s2419_s10  ;;  %s2879_s15 = scalar_lea.hbm %s3604_s9, 2048 }
  0x48   : > { %s2874_s18 = scalar_lea.hbm %s3174_s13, 1024  ;;  %p2880_p3 = scmp.lt.u32.totalorder %s3174_s13, %s3604_s9 }
  0x49   : > { %p2875_p12 = scmp.ne.s32.totalorder %s3174_s13, %s2874_s18  ;;  %p2881_p6 = scmp.lt.u32.totalorder %s2879_s15, %s2874_s18 }
  0x4a   : > { %p2883_p4 = scmp.lt.u32.totalorder %s2874_s18, %s3174_s13 }
  0x4b   : > { %p2877_p0 = pnand %p2876_p13, %p2875_p12  ;;  %p2882_p1 = por %p2881_p6, %p2880_p3 }
  0x4d   : > { %p2878_p2 = pneg %p2877_p0  ;;  %p2884_p5 = por %p2883_p4, %p2882_p1 }
  0x4f   : > { %p2885_p8 = pnand %p2884_p5, %p2878_p2 }
  0x51   : > { %2888 = shalt.err (!%p2885_p8)
}
  0x52   : > { %s2889_s30 = scalar_lea.vmem %s3180_s17, 1024  ;;  %s2979_s12 = smov [#allocation3]  }
  0x53   : > { %p2890_p9 = scmp.ne.s32.totalorder %s3180_s17, %s2889_s30  ;;  %s2894_s11 = sshll.u32 %s2979_s12, 4  ;;  %s2895_s11 = int_to_ptr.vmem [resolvable:$false] %s2894_s11 }
  0x54   : > { %s2896_s10 = scalar_lea.vmem %s2895_s11, 2048  ;;  %p2897_p12 = scmp.lt.s32.totalorder %s3180_s17, %s2895_s11 }
  0x55   : > { %p2892_p10 = pnand %p2890_p9, %p2876_p13  ;;  %p2898_p0 = scmp.lt.s32.totalorder %s2896_s10, %s2889_s30 }
  0x57   : > { %p2893_p11 = pneg %p2892_p10  ;;  %p2899_p3 = por %p2898_p0, %p2897_p12 }
  0x59   : > { %p2900_p6 = pnand %p2899_p3, %p2893_p11 }
  0x5b   : > { %2903 = shalt.err (!%p2900_p6)
}
  0x5c   : > { %s3606_s18 = smov 4   ;;  %s3607_s15 = smov 64  }
  0x5d   : > { %2647 = dma.hbm_to_vmem [thread:$0]  (!%p3176_p7), %s3174_s13, 1024, %s3180_s17, %s3182_s26, %s3607_s15, %s3607_s15, %s3606_s18  }
  0x5e   : > { %p3608_p13 = scmp.ne.s32.totalorder %s3598_s29, 0 }
  0x5f   : > { %s587_s14 = sand.u32 (!%p3608_p13), 1, %s2950_s19   ;;  %p3609_p2 = scmp.ne.s32.totalorder (!%p3608_p13), %s3597_s28, 0 }
  0x60   : > { %585 = sbr.rel (%p3608_p13) target bundleno = 3340 (0xd0c), region = 80  ;;  %s2332_s12 = sshll.u32 (!%p3608_p13), %s587_s14, 6 }
  0x61   : > { %s588_s30 = scalar_lea.sflag (!%p3608_p13), [#allocation4], %s587_s14  ;;  %s3216_s11 = scalar_lea.vmem (!%p3608_p13), [#allocation3], %s2332_s12 }
  0x67   : > { %2937 = dma.done.wait (%p3609_p2), %s588_s30, 1024  }
  0x68   : > { %2939 = vsyncadd (%p3609_p2), %s588_s30, 4294966272  ;;  %p3610_p1 = scmp.ne.s32.totalorder %s3596_s27, 0 }
  0x6a   : > { %2941 = dma.done.wait (%p3610_p1), [#allocation6], 1024  }
  0x6b   : > { %2943 = vsyncadd (%p3610_p1), [#allocation6], 4294966272  ;;  %p686_p7 = scmp.lt.s32.totalorder %s2962_s22, 1  ;;  %p691_p4 = scmp.lt.s32.totalorder %s2958_s21, 1 }
  0x6c   : > { %s3611_s0 = sld [smem:[#allocation17_spill]]  ;;  %s3612_s1 = sld [smem:[#allocation18_spill]] }
  0x6d   : > { %s3645_s22 = smov (!%p686_p7, %s2962_s22), 1  ;;  %s3613_s3 = sld [smem:[#allocation20_spill]] }
  0x6e   : > { %s3230_s13 = scalar_select %p691_p4, %s2958_s21, 1 }
  0x6f   : > { %s2420_s24 = sshll.u32 %s3645_s22, 4  ;;  %s2341_s27 = sshll.u32 %s3645_s22, 3 }
  0x70   : > { %s2632_s26 = smul.u32 192, %s3230_s13  ;;  %s2421_s18 = sshll.u32 %s3230_s13, 6 }
  0x71   : > { %s2633_s10 = smul.u32 3, %s3230_s13  ;;  %s3614_s2 = sld [smem:[#allocation19_spill]] }
  0x72   : > { %s690_s17 = scalar_lea.vmem %s3611_s0, %s2420_s24  ;;  %s3241_s12 = scalar_lea.vmem %s3612_s1, %s2632_s26 }
  0x73   : > { %s3246_s23 = scalar_lea.vmem %s3613_s3, %s2421_s18  ;;  %s3268_s3 = scalar_lea.vmem %s3557_s7, %s2421_s18 }
  0x74   : > { %s3617_s24 = sld [smem:[#allocation24_spill]]  ;;  %s3618_s19 = sld [smem:[#allocation25_spill]] }
  0x75   : > { %s3619_s14 = sld [smem:[#allocation26_spill]]  ;;  %s3620_s18 = sld [smem:[#allocation29_spill]] }
  0x76   : > { %p2342_p5 = scmp.ne.s32.totalorder %s2958_s21, 0 }
  0x77   : > { %s3251_s22 = scalar_lea.vmem %s3614_s2, %s2633_s10  ;;  %s721_s10 = scalar_lea.vmem %s3558_s8, %s3230_s13  ;;  %v740_v0 = vld [vmem:[%s690_s17] sm:$0xff] (!%p2342_p5)  ;;  %v741_v1 = vld [vmem:[%s690_s17 + $0x8] sm:$0x1f] (!%p2342_p5) }
  0x78   : > { %739 = sbr.rel (%p2342_p5) target bundleno = 127 (0x7f), region = 92  ;;  %742 = vst [vmem:[#allocation2] sm:$0xff] (!%p2342_p5), %v740_v0  ;;  %743 = vst [vmem:[#allocation2 + $0x8] sm:$0x1f] (!%p2342_p5), %v741_v1 }
  0x7a   : > { %s724_s29 = scalar_lea.vmem %s3617_s24, %s3230_s13  ;;  %s727_s15 = scalar_lea.vmem %s3618_s19, %s3230_s13 }
  0x7b   : > { %s730_s1 = scalar_lea.vmem %s3619_s14, %s3230_s13  ;;  %s3289_s30 = scalar_lea.vmem %s3620_s18, %s2341_s27 }
  0x7f PF: > { %v2742_v2 = vld [vmem:[%s3241_s12 + $0x4] ss:$12 sps:$4 sm:$0xff]   ;;  %v2744_v3 = vld [vmem:[%s3241_s12] ss:$12 sps:$4 sm:$0xff]   ;;  %v2980_v4 = vmov 0   ;;  %v2981_v5 = vmov 0.0   ;;  %v746_v31 = vlaneseq  ;;  %s3621_s27 = scalar_lea.vmem %s3554_s4, %s3230_s13 }
  0x80   : > { %961 = vmatprep.mubr.bf16.mxu0 %v2980_v4  ;;  %2484 = vmatprep.subr.bf16.mxu1 %v2981_v5  ;;  %v2745_v6 = vld [vmem:[%s3241_s12 + $0x1c] ss:$12 sps:$4 sm:$0xff]   ;;  %v2747_v7 = vld [vmem:[%s3241_s12 + $0x18] ss:$12 sps:$4 sm:$0xff]   ;;  %v2748_v8 = vld [vmem:[%s3241_s12 + $0x34] ss:$12 sps:$4 sm:$0xff]  }
  0x81   : > { %929 = vmatprep.subr.bf16.mxu0 %v2742_v2  ;;  %v2750_v9 = vld [vmem:[%s3241_s12 + $0x30] ss:$12 sps:$4 sm:$0xff]   ;;  %v2751_v10 = vld [vmem:[%s3241_s12 + $0x4c] ss:$12 sps:$4 sm:$0xff]   ;;  %v2753_v11 = vld [vmem:[%s3241_s12 + $0x48] ss:$12 sps:$4 sm:$0xff]  }
  0x82   : > { %930 = vmatpush1.bf16.msra.mxu0 %v2744_v3  ;;  %v2754_v12 = vld [vmem:[%s3241_s12 + $0x64] ss:$12 sps:$4 sm:$0xff]   ;;  %v2766_v13 = vld [vmem:[%s3241_s12 + $0x8] ss:$12 sps:$4 sm:$0xff]   ;;  %v2767_v14 = vld [vmem:[%s3241_s12 + $0x20] ss:$12 sps:$4 sm:$0xff]  }
  0x83   : > { %931 = vmatprep.subr.bf16.mxu0 %v2745_v6  ;;  %2485 = vmatpush3.bf16.msra.mxu1 %v2766_v13  ;;  %v2756_v15 = vld [vmem:[%s3241_s12 + $0x60] ss:$12 sps:$4 sm:$0xff]   ;;  %v2757_v16 = vld [vmem:[%s3241_s12 + $0x7c] ss:$12 sps:$4 sm:$0xff]   ;;  %v2759_v17 = vld [vmem:[%s3241_s12 + $0x78] ss:$12 sps:$4 sm:$0xff]  }
  0x84   : > { %2486 = vmatprep.subr.bf16.mxu1 %v2981_v5  ;;  %v2760_v18 = vld [vmem:[%s3241_s12 + $0x94] ss:$12 sps:$4 sm:$0xff]   ;;  %v2768_v19 = vld [vmem:[%s3241_s12 + $0x38] ss:$12 sps:$4 sm:$0xff]   ;;  %v2769_v20 = vld [vmem:[%s3241_s12 + $0x50] ss:$12 sps:$4 sm:$0xff]  }
  0x85   : > { %v2762_v21 = vld [vmem:[%s3241_s12 + $0x90] ss:$12 sps:$4 sm:$0xff]   ;;  %v2763_v22 = vld [vmem:[%s3241_s12 + $0xac] ss:$12 sps:$4 sm:$0xff]   ;;  %v2770_v23 = vld [vmem:[%s3241_s12 + $0x68] ss:$12 sps:$4 sm:$0xff]  }
  0x86   : > { %932 = vmatpush1.bf16.msra.mxu0 %v2747_v7  ;;  %v2765_v24 = vld [vmem:[%s3241_s12 + $0xa8] ss:$12 sps:$4 sm:$0xff]   ;;  %v3317_v25 = vld [vmem:[#allocation2] sm:$0xff]  ;;  %v2773_v30 = vld [vmem:[%s3241_s12 + $0xb0] ss:$12 sps:$4 sm:$0xff]   ;;  %vm2982_vm0 = vmmov 0  }
  0x87   : > { %933 = vmatprep.subr.bf16.mxu0 %v2748_v8  ;;  %2487 = vmatpush3.bf16.msra.mxu1 %v2767_v14  ;;  %v3319_v26 = vld [vmem:[#allocation2 + $0x8] sm:$0x1f]  ;;  %v2772_v29 = vld [vmem:[%s3241_s12 + $0x98] ss:$12 sps:$4 sm:$0xff]   ;;  %v787_v32 = vshrl.u32 %v746_v31, 7  ;;  %vm1015_vm1 = vcmask 261120  }
  0x88   : > { %2488 = vmatprep.subr.bf16.mxu1 %v2981_v5  ;;  %v2771_v27 = vld [vmem:[%s3241_s12 + $0x80] ss:$12 sps:$4 sm:$0xff]   ;;  %v751_v28 = vpack.c.bf16 %v3319_v26, %v3317_v25  ;;  %2500 = vmatprep.mubr.msk.bf16.mxu1 %vm2982_vm0, %v2981_v5  ;;  %vm1094_vm2 = vcmask 1045504   ;;  %vm1095_vm3 = vcmask 1046528   ;;  %v2983_v58 = vmov 65535   ;;  %s2984_s2 = smov 96  }
  0x89   : > { %v788_v33 = vsub.s32 0, %v787_v32  ;;  %v784_v34 = vld [vmem:[%s3251_s22] sm:$0x7]  ;;  %v792_v35 = vsub.s32 1, %v787_v32  ;;  %v796_v49 = vsub.s32 2, %v787_v32  ;;  %v1096_v59 = vsel %vm1094_vm2, 4294967295, %v2983_v58 }
  0x8a   : > { %934 = vmatpush1.bf16.msra.mxu0 %v2750_v9  ;;  %v3347_v60 = vsel %vm1095_vm3, %v1096_v59, 0  ;;  %vm1065_vm4 = vcmask 105472   ;;  %vm1069_vm5 = vcmask 102400   ;;  %s2985_s5 = smov 32   ;;  %s2986_s6 = smov 64   ;;  %vm1546_vm6 = vcmask 523264  }
  0x8b   : > { %935 = vmatprep.subr.bf16.mxu0 %v2751_v10  ;;  %2489 = vmatpush3.bf16.msra.mxu1 %v2768_v19  ;;  %v789_v36 = vrot.slane %v784_v34, %v788_v33  ;;  %v793_v38 = vrot.slane %v784_v34, %v792_v35  ;;  %v797_v50 = vrot.slane %v784_v34, %v796_v49  ;;  %vm1549_vm7 = vcmask 785408   ;;  %s3622_s12 = sld [smem:[#allocation21_spill]]  ;;  %s3624_s28 = sld [smem:[#allocation22_spill]] }
  0x8c   : > { %2490 = vmatprep.subr.bf16.mxu1 %v2981_v5  ;;  %vm1671_vm8 = vcmask 1044480   ;;  %p2407_p8 = scmp.ne.s32.totalorder %s2958_s21, 1 }
  0x8d   : > { %vm2988_vm10 = vmmov (!%p2407_p8), 0  }
  0x8e   : > { %936 = vmatpush1.bf16.msra.mxu0 %v2753_v11 }
  0x8f   : > { %937 = vmatprep.subr.bf16.mxu0 %v2754_v12  ;;  %2491 = vmatpush3.bf16.msra.mxu1 %v2769_v20 }
  0x90   : > { %2492 = vmatprep.subr.bf16.mxu1 %v2981_v5 }
  0x91   : > { %s3623_s22 = scalar_lea.vmem %s3622_s12, %s3230_s13  ;;  %s3625_s24 = scalar_lea.vmem %s3624_s28, %s3230_s13 }
  0x92   : > { %938 = vmatpush1.bf16.msra.mxu0 %v2756_v15  ;;  %s3629_s13 = sld [smem:[#allocation28_spill]] (!%p2407_p8) }
  0x93   : > { %939 = vmatprep.subr.bf16.mxu0 %v2757_v16  ;;  %2493 = vmatpush3.bf16.msra.mxu1 %v2770_v23 }
  0x94   : > { %2494 = vmatprep.subr.bf16.mxu1 %v2981_v5 }
  0x96   : > { %940 = vmatpush1.bf16.msra.mxu0 %v2759_v17 }
  0x97   : > { %941 = vmatprep.subr.bf16.mxu0 %v2760_v18  ;;  %2495 = vmatpush3.bf16.msra.mxu1 %v2771_v27 }
  0x98   : > { %2496 = vmatprep.subr.bf16.mxu1 %v2981_v5 }
  0x9a   : > { %942 = vmatpush1.bf16.msra.mxu0 %v2762_v21 }
  0x9b   : > { %943 = vmatprep.subr.bf16.mxu0 %v2763_v22  ;;  %2497 = vmatpush3.bf16.msra.mxu1 %v2772_v29 }
  0x9c   : > { %2498 = vmatprep.subr.bf16.mxu1 %v2981_v5 }
  0x9e   : > { %944 = vmatpush1.bf16.msra.mxu0 %v2765_v24 }
  0x9f   : > { %2528 = vmatprep.subr.bf16.mxu0 %v2981_v5  ;;  %2499 = vmatpush3.bf16.msra.mxu1 %v2773_v30 }
  0xa0   : > { %2504 = vmatprep.subr.bf16.mxu1 %v2981_v5 }
  0xa1   : > { %962 = vmatmul.mubr.bf16.vlgmr.msra.gmra.mrb[0].mxu0 %v751_v28 }
  0xa2   : > { %2530 = vmatprep.mubr.msk.bf16.mxu0 %vm2982_vm0, %v2981_v5  ;;  %2501 = vmatmul.mubr.bf16.vlgmr.msra.gmra.mrb[0].mxu1 %v751_v28 }
  0xa3   : > { %2506 = vmatprep.mubr.msk.bf16.mxu1 %vm2982_vm0, %v2981_v5 }
 0x174   : > { %v963_v37 = vpop.f32.mrb[0].mxu0 }
 0x175   : > { %v965_v39 = vpop.f32.mrb[1].mxu0  ;;  %v964_v41 = vadd.f32 %v963_v37, %v789_v36  ;;  %v1006_v51 = vpop.f32.mrb[0].mxu1 }
 0x176   : > { %v967_v40 = vpop.f32.mrb[2].mxu0  ;;  %v966_v44 = vadd.f32 %v965_v39, %v793_v38  ;;  %v1007_v52 = vadd.f32 %v1006_v51, %v797_v50  ;;  %v2502_v53 = vpop.f32.mrb[1].mxu1 }
 0x177   : > { %v968_v42 = vadd.f32 %v967_v40, %v789_v36  ;;  %v969_v43 = vpop.f32.mrb[3].mxu0  ;;  %v1009_v54 = vpop.f32.mrb[2].mxu1 }
 0x178   : > { %v970_v45 = vadd.f32 %v969_v43, %v793_v38  ;;  %v1010_v55 = vadd.f32 %v1009_v54, %v797_v50  ;;  %v2503_v56 = vpop.f32.mrb[3].mxu1 }
 0x179   : > { %v1013_v46 = vpack.c.bf16 %v968_v42, %v964_v41 }
 0x17a   : > { %v1014_v47 = vpack.c.bf16 %v970_v45, %v966_v44  ;;  %v3345_v57 = vpack.c.bf16 %v1010_v55, %v1007_v52 }
 0x17c   : > { %v1020_v48 = vsel %vm1015_vm1, %v1014_v47, 0  ;;  %v1099_v61 = vand.u32 %v3347_v60, %v3345_v57 }
 0x17d   : > { %2505 = vmatpush3.bf16.xpose.msra.mxu1 %v1020_v48 }
 0x17e   : > { %2510 = vmatprep.subr.bf16.mxu1 %v2981_v5 }
 0x184   : > { %2507 = vmatmul.mubr.msk.bf16.vlgmr.msra.gmra.mrb[4].mxu1 %vm1015_vm1, %v1013_v46 }
 0x185   : > { %2512 = vmatprep.mubr.msk.bf16.mxu1 %vm2982_vm0, %v2981_v5  ;;  %2511 = vmatpush3.bf16.msra.mxu1 %v1099_v61 }
 0x186   : > { %2516 = vmatprep.subr.bf16.mxu1 %v2981_v5 }
 0x257   : > { %v1056_v62 = vpop.f32.mrb[4].mxu1 }
 0x258   : > { %v1063_v63 = vmul.f32 0.35355338, %v1056_v62  ;;  %v2508_v0 = vpop.f32.mrb[5].mxu1 }
 0x259   : > { %v1059_v1 = vpop.f32.mrb[6].mxu1 }
 0x25a   : > { %v1064_v2 = vmul.f32 0.35355338, %v1059_v1  ;;  %v2509_v3 = vpop.f32.mrb[7].mxu1  ;;  %v1066_v4 = vsel %vm1065_vm4, %v1063_v63, -inf }
 0x25b   : > { %1067 = vmax.xlane.f32.xlu0 %v1066_v4 }
 0x25c   : > { %v1070_v6 = vsel %vm1069_vm5, %v1064_v2, -inf }
 0x25f   : > { %1071 = vmax.xlane.f32.xlu0 %v1070_v6 }
 0x275   : > { %1146 = vrot.lane.b32.xlu0 %v1014_v47, %s2984_s2 }
 0x279   : > { %1397 = vrot.lane.b32.xlu0 %v1014_v47, %s2985_s5 }
 0x2e8   : > { %v1068_v7 = vpop.xlane.xlu0 %1067 }
 0x2e9   : > { %v1073_v8 = vsub.f32 %v1063_v63, %v1068_v7 }
 0x2eb   : > { %v1075_v9 = vmul.f32 1.442695, %v1073_v8 }
 0x2ec   : > { %v1072_v10 = vpop.xlane.xlu0 %1071 }
 0x2ed   : > { %2798 = vpow2.f32 %v1075_v9  ;;  %v1074_v11 = vsub.f32 %v1064_v2, %v1072_v10 }
 0x2ef   : > { %v1077_v12 = vmul.f32 1.442695, %v1074_v11 }
 0x2f0   : > { %v1147_v20 = vpop.permute.xlu0 %1146 }
 0x2f1   : > { %2800 = vpow2.f32 %v1077_v12  ;;  %v1152_v32 = vsel %vm1015_vm1, %v1147_v20, 0 }
 0x2f4   : > { %v1398_v29 = vpop.permute.xlu0 %1397 }
 0x2f5   : > { %v1403_v34 = vsel %vm1015_vm1, %v1398_v29, 0 }
 0x2f7   : > { %v2799_v13 = vpop.eup %2798 }
 0x2f8   : > { %v1079_v14 = vsel %vm1065_vm4, %v2799_v13, 0.0 }
 0x2f9   : > { %1080 = vadd.xlane.f32.xlu1 %v1079_v14 }
 0x2fb   : > { %v2801_v15 = vpop.eup %2800 }
 0x2fc   : > { %v1082_v16 = vsel %vm1069_vm5, %v2801_v15, 0.0 }
 0x2fd   : > { %1083 = vadd.xlane.f32.xlu1 %v1082_v16 }
 0x30e   : > { %1143 = vrot.lane.b32.xlu1 %v1013_v46, %s2984_s2 }
 0x312   : > { %1272 = vrot.lane.b32.xlu1 %v1014_v47, %s2986_s6 }
 0x316   : > { %1270 = vrot.lane.b32.xlu1 %v1013_v46, %s2986_s6 }
 0x31a   : > { %1395 = vrot.lane.b32.xlu1 %v1013_v46, %s2985_s5 }
 0x386   : > { %v1081_v17 = vpop.xlane.xlu1 %1080 }
 0x387   : > { %2802 = vrcp.f32 %v1081_v17 }
 0x38a   : > { %v1084_v18 = vpop.xlane.xlu1 %1083 }
 0x38b   : > { %2804 = vrcp.f32 %v1084_v18 }
 0x38e   : > { %v1144_v19 = vpop.permute.xlu1 %1143 }
 0x391   : > { %v2803_v22 = vpop.eup %2802 }
 0x392   : > { %v1273_v21 = vpop.permute.xlu1 %1272  ;;  %v1087_v27 = vmul.f32 %v2803_v22, %v2799_v13 }
 0x393   : > { %v1278_v23 = vsel %vm1015_vm1, %v1273_v21, 0 }
 0x394   : > { %2529 = vmatpush3.bf16.xpose.msra.mxu0 %v1278_v23 }
 0x395   : > { %v2805_v24 = vpop.eup %2804  ;;  %2540 = vmatprep.subr.bf16.mxu0 %v2981_v5 }
 0x396   : > { %v1088_v28 = vmul.f32 %v2805_v24, %v2801_v15  ;;  %v1271_v33 = vpop.permute.xlu1 %1270 }
 0x398   : > { %v1089_v30 = vpack.c.bf16 %v1088_v28, %v1087_v27 }
 0x39a   : > { %2513 = vmatmul.mubr.msk.bf16.vlgmr.msra.gmra.mrb[8].mxu1 %vm1065_vm4, %v1089_v30  ;;  %v1396_v35 = vpop.permute.xlu1 %1395 }
 0x39b   : > { %2517 = vmatpush3.bf16.xpose.msra.mxu1 %v1152_v32  ;;  %2531 = vmatmul.mubr.msk.bf16.vlgmr.msra.gmra.mrb[4].mxu0 %vm1015_vm1, %v1271_v33 }
 0x39c   : > { %2541 = vmatpush3.bf16.xpose.msra.mxu0 %v1403_v34  ;;  %2518 = vmatprep.mubr.msk.bf16.mxu1 %vm2982_vm0, %v2981_v5 }
 0x39d   : > { %2542 = vmatprep.mubr.msk.bf16.mxu0 %vm2982_vm0, %v2981_v5  ;;  %2522 = vmatprep.subr.bf16.mxu1 %v2981_v5 }
 0x39e   : > { %2552 = vmatprep.subr.bf16.mxu0 %v2981_v5 }
 0x3a2   : > { %2519 = vmatmul.mubr.msk.bf16.vlgmr.msra.gmra.mrb[12].mxu1 %vm1015_vm1, %v1144_v19 }
 0x3a3   : > { %2543 = vmatmul.mubr.msk.bf16.vlgmr.msra.gmra.mrb[8].mxu0 %vm1015_vm1, %v1396_v35  ;;  %2524 = vmatprep.mubr.msk.bf16.mxu1 %vm2982_vm0, %v2981_v5 }
 0x3a4   : > { %2568 = vmatprep.mubr.msk.bf16.mxu0 %vm2982_vm0, %v2981_v5 }
 0x46d   : > { %v3380_v36 = vpop.f32.mrb[8].mxu1 }
 0x46e   : > { %v2514_v37 = vpop.f32.mrb[9].mxu1  ;;  %v1314_v38 = vpop.f32.mrb[4].mxu0 }
 0x46f   : > { %v3382_v39 = vpop.f32.mrb[10].mxu1  ;;  %v2532_v40 = vpop.f32.mrb[5].mxu0  ;;  %v1321_v48 = vmul.f32 0.35355338, %v1314_v38 }
 0x470   : > { %v2515_v41 = vpop.f32.mrb[11].mxu1  ;;  %v1317_v42 = vpop.f32.mrb[6].mxu0 }
 0x471   : > { %v2533_v43 = vpop.f32.mrb[7].mxu0  ;;  %v1322_v59 = vmul.f32 0.35355338, %v1317_v42  ;;  %v1323_v61 = vsel %vm1065_vm4, %v1321_v48, -inf }
 0x473   : > { %v1326_v0 = vsel %vm1069_vm5, %v1322_v59, -inf }
 0x475   : > { %v1188_v44 = vpop.f32.mrb[12].mxu1 }
 0x476   : > { %v1195_v45 = vmul.f32 0.35355338, %v1188_v44  ;;  %v2520_v46 = vpop.f32.mrb[13].mxu1  ;;  %v1439_v47 = vpop.f32.mrb[8].mxu0 }
 0x477   : > { %v1191_v49 = vpop.f32.mrb[14].mxu1  ;;  %v2544_v50 = vpop.f32.mrb[9].mxu0  ;;  %v1446_v63 = vmul.f32 0.35355338, %v1439_v47 }
 0x478   : > { %v1196_v51 = vmul.f32 0.35355338, %v1191_v49  ;;  %v2521_v52 = vpop.f32.mrb[15].mxu1  ;;  %v1442_v53 = vpop.f32.mrb[10].mxu0  ;;  %v1197_v54 = vsel %vm1065_vm4, %v1195_v45, -inf }
 0x479   : > { %v2545_v55 = vpop.f32.mrb[11].mxu0  ;;  %1198 = vmax.xlane.f32.xlu0 %v1197_v54  ;;  %v1447_v56 = vmul.f32 0.35355338, %v1442_v53  ;;  %v1448_v1 = vsel %vm1065_vm4, %v1446_v63, -inf }
 0x47a   : > { %v1200_v58 = vsel %vm1069_vm5, %v1196_v51, -inf }
 0x47b   : > { %1201 = vmax.xlane.f32.xlu1 %v1200_v58  ;;  %v1451_v62 = vsel %vm1069_vm5, %v1447_v56, -inf }
 0x47d   : > { %1324 = vmax.xlane.f32.xlu0 %v1323_v61 }
 0x47f   : > { %1452 = vmax.xlane.f32.xlu1 %v1451_v62 }
 0x481   : > { %1327 = vmax.xlane.f32.xlu0 %v1326_v0 }
 0x485   : > { %1449 = vmax.xlane.f32.xlu0 %v1448_v1 }
 0x506   : > { %v1199_v2 = vpop.xlane.xlu0 %1198 }
 0x507   : > { %v1203_v12 = vsub.f32 %v1195_v45, %v1199_v2  ;;  %v2774_v2 = vld [vmem:[%s3246_s23] sm:$0xff]  }
 0x508   : > { %v1202_v3 = vpop.xlane.xlu1 %1201  ;;  %2553 = vmatpush3.bf16.msra.mxu0 %v2774_v2  ;;  %v2783_v2 = vld [vmem:[%s3268_s3 + $0x8] sm:$0xff]  }
 0x509   : > { %v1204_v13 = vsub.f32 %v1196_v51, %v1202_v3  ;;  %v1205_v18 = vmul.f32 1.442695, %v1203_v12  ;;  %2554 = vmatprep.subr.bf16.mxu0 %v2981_v5  ;;  %v2776_v3 = vld [vmem:[%s3246_s23 + $0x10] sm:$0xff]  }
 0x50a   : > { %v1325_v4 = vpop.xlane.xlu0 %1324 }
 0x50b   : > { %v1329_v6 = vsub.f32 %v1321_v48, %v1325_v4  ;;  %v1207_v19 = vmul.f32 1.442695, %v1204_v13  ;;  %v2777_v4 = vld [vmem:[%s3246_s23 + $0x18] sm:$0xff]   ;;  %v2780_v13 = vld [vmem:[%s3246_s23 + $0x30] sm:$0xff]  }
 0x50c   : > { %v1453_v7 = vpop.xlane.xlu1 %1452 }
 0x50d   : > { %v1331_v8 = vmul.f32 1.442695, %v1329_v6  ;;  %v1455_v9 = vsub.f32 %v1447_v56, %v1453_v7  ;;  %v2778_v6 = vld [vmem:[%s3246_s23 + $0x20] sm:$0xff]  }
 0x50e   : > { %v1328_v10 = vpop.xlane.xlu0 %1327 }
 0x50f   : > { %2806 = vpow2.f32 %v1331_v8  ;;  %v1330_v11 = vsub.f32 %v1322_v59, %v1328_v10  ;;  %v1458_v14 = vmul.f32 1.442695, %v1455_v9  ;;  %v2779_v9 = vld [vmem:[%s3246_s23 + $0x28] sm:$0xff]  }
 0x511   : > { %v1333_v15 = vmul.f32 1.442695, %v1330_v11 }
 0x512   : > { %v1450_v16 = vpop.xlane.xlu0 %1449 }
 0x513   : > { %2808 = vpow2.f32 %v1333_v15  ;;  %v1454_v17 = vsub.f32 %v1446_v63, %v1450_v16  ;;  %v2781_v16 = vld [vmem:[%s3246_s23 + $0x38] sm:$0xff]  }
 0x514   : > { %2810 = vpow2.f32 %v1458_v14 }
 0x515   : > { %v1456_v20 = vmul.f32 1.442695, %v1454_v17 }
 0x517   : > { %2812 = vpow2.f32 %v1456_v20 }
 0x518   : > { %2814 = vpow2.f32 %v1205_v18 }
 0x519   : > { %v2807_v21 = vpop.eup %2806  ;;  %2816 = vpow2.f32 %v1207_v19 }
 0x51a   : > { %v1335_v22 = vsel %vm1065_vm4, %v2807_v21, 0.0 }
 0x51b   : > { %1336 = vadd.xlane.f32.xlu0 %v1335_v22 }
 0x51d   : > { %v2809_v23 = vpop.eup %2808 }
 0x51e   : > { %v1338_v24 = vsel %vm1069_vm5, %v2809_v23, 0.0  ;;  %v2811_v27 = vpop.eup %2810 }
 0x51f   : > { %1339 = vadd.xlane.f32.xlu1 %v1338_v24  ;;  %v1463_v32 = vsel %vm1069_vm5, %v2811_v27, 0.0 }
 0x521   : > { %v2813_v28 = vpop.eup %2812 }
 0x522   : > { %v2815_v29 = vpop.eup %2814  ;;  %v1460_v30 = vsel %vm1065_vm4, %v2813_v28, 0.0 }
 0x523   : > { %v2817_v33 = vpop.eup %2816  ;;  %1461 = vadd.xlane.f32.xlu0 %v1460_v30  ;;  %1464 = vadd.xlane.f32.xlu1 %v1463_v32  ;;  %v1209_v34 = vsel %vm1065_vm4, %v2815_v29, 0.0 }
 0x524   : > { %v1212_v35 = vsel %vm1069_vm5, %v2817_v33, 0.0 }
 0x527   : > { %1210 = vadd.xlane.f32.xlu0 %v1209_v34  ;;  %1213 = vadd.xlane.f32.xlu1 %v1212_v35 }
 0x538   : > { %1346 = vrot.lane.b32.xlu1 %v3345_v57, %s2986_s6 }
 0x53c   : > { %1471 = vrot.lane.b32.xlu1 %v3345_v57, %s2985_s5 }
 0x53d   : > { %1221 = vrot.lane.b32.xlu0 %v3345_v57, %s2984_s2 }
 0x5a8   : > { %v1337_v37 = vpop.xlane.xlu0 %1336 }
 0x5ac   : > { %v1340_v38 = vpop.xlane.xlu1 %1339 }
 0x5b0   : > { %v1462_v40 = vpop.xlane.xlu0 %1461  ;;  %v1465_v41 = vpop.xlane.xlu1 %1464 }
 0x5b4   : > { %v1211_v42 = vpop.xlane.xlu0 %1210  ;;  %v1214_v43 = vpop.xlane.xlu1 %1213 }
 0x5b5   : > { %2818 = vrcp.f32 %v1211_v42 }
 0x5b6   : > { %2820 = vrcp.f32 %v1214_v43 }
 0x5b7   : > { %2822 = vrcp.f32 %v1340_v38 }
 0x5b8   : > { %v1222_v44 = vpop.permute.xlu0 %1221  ;;  %2824 = vrcp.f32 %v1337_v37  ;;  %v1347_v49 = vpop.permute.xlu1 %1346 }
 0x5b9   : > { %v1227_v45 = vand.u32 %v1222_v44, %v3347_v60  ;;  %2826 = vrcp.f32 %v1462_v40  ;;  %v1352_v52 = vand.u32 %v1347_v49, %v3347_v60 }
 0x5ba   : > { %2828 = vrcp.f32 %v1465_v41 }
 0x5bb   : > { %2523 = vmatpush3.bf16.msra.mxu1 %v1227_v45 }
 0x5bc   : > { %2534 = vmatprep.subr.bf16.mxu1 %v2981_v5  ;;  %v1472_v56 = vpop.permute.xlu1 %1471 }
 0x5bd   : > { %v1477_v62 = vand.u32 %v1472_v56, %v3347_v60  ;;  %v2775_v60 = vld [vmem:[%s3246_s23 + $0x8] sm:$0xff]  }
 0x5be   : > { %2555 = vmatpush3.bf16.msra.mxu0 %v2775_v60  ;;  %v2784_v60 = vld [vmem:[%s3268_s3 + $0x10] sm:$0xff]  }
 0x5bf   : > { %v2819_v46 = vpop.eup %2818  ;;  %2556 = vmatprep.subr.bf16.mxu0 %v2981_v5 }
 0x5c0   : > { %v2821_v47 = vpop.eup %2820  ;;  %v1217_v48 = vmul.f32 %v2819_v46, %v2815_v29 }
 0x5c1   : > { %v1218_v57 = vmul.f32 %v2821_v47, %v2817_v33  ;;  %v2823_v51 = vpop.eup %2822 }
 0x5c2   : > { %v2825_v53 = vpop.eup %2824  ;;  %v1344_v54 = vmul.f32 %v2823_v51, %v2809_v23  ;;  %2557 = vmatpush3.bf16.msra.mxu0 %v2776_v3  ;;  %v2785_v3 = vld [vmem:[%s3268_s3 + $0x18] sm:$0xff]  }
 0x5c3   : > { %v1219_v50 = vpack.c.bf16 %v1218_v57, %v1217_v48  ;;  %v1343_v55 = vmul.f32 %v2825_v53, %v2807_v21  ;;  %v2827_v58 = vpop.eup %2826  ;;  %2558 = vmatprep.subr.bf16.mxu0 %v2981_v5  ;;  %v2782_v53 = vld [vmem:[%s3268_s3] sm:$0xff]  }
 0x5c4   : > { %v2829_v61 = vpop.eup %2828  ;;  %v1468_v63 = vmul.f32 %v2827_v58, %v2813_v28 }
 0x5c5   : > { %2525 = vmatmul.mubr.msk.bf16.vlgmr.msra.gmra.mrb[16].mxu1 %vm1065_vm4, %v1219_v50  ;;  %v1345_v59 = vpack.c.bf16 %v1344_v54, %v1343_v55  ;;  %v1469_v0 = vmul.f32 %v2829_v61, %v2811_v27  ;;  %v747_v54 = vand.u32 127, %v746_v31 }
 0x5c6   : > { %2535 = vmatpush3.bf16.msra.mxu1 %v1352_v52  ;;  %2536 = vmatprep.mubr.msk.bf16.mxu1 %vm2982_vm0, %v2981_v5 }
 0x5c7   : > { %2546 = vmatprep.subr.bf16.mxu1 %v2981_v5  ;;  %v1470_v1 = vpack.c.bf16 %v1469_v0, %v1468_v63  ;;  %2559 = vmatpush3.bf16.msra.mxu0 %v2777_v4  ;;  %vm748_vm9 = vcmp.lt.s32.totalorder %v747_v54, 32  ;;  %v2786_v4 = vld [vmem:[%s3268_s3 + $0x20] sm:$0xff]  }
 0x5c8   : > { %2560 = vmatprep.subr.bf16.mxu0 %v2981_v5 }
 0x5cb   : > { %2561 = vmatpush3.bf16.msra.mxu0 %v2778_v6  ;;  %v2787_v6 = vld [vmem:[%s3268_s3 + $0x28] sm:$0xff]  }
 0x5cc   : > { %2562 = vmatprep.subr.bf16.mxu0 %v2981_v5 }
 0x5cd   : > { %2537 = vmatmul.mubr.msk.bf16.vlgmr.msra.gmra.mrb[20].mxu1 %vm1065_vm4, %v1345_v59 }
 0x5ce   : > { %2547 = vmatpush3.bf16.msra.mxu1 %v1477_v62  ;;  %2548 = vmatprep.mubr.msk.bf16.mxu1 %vm2982_vm0, %v2981_v5 }
 0x5cf   : > { %2572 = vmatprep.subr.bf16.mxu1 %v2981_v5  ;;  %2563 = vmatpush3.bf16.msra.mxu0 %v2779_v9  ;;  %v2790_v9 = vld [vmem:[%s3216_s11] sm:$0xff]  }
 0x5d0   : > { %2564 = vmatprep.subr.bf16.mxu0 %v2981_v5 }
 0x5d3   : > { %2565 = vmatpush3.bf16.msra.mxu0 %v2780_v13  ;;  %v2794_v13 = vld [vmem:[%s3216_s11 + $0x20] sm:$0xff]  }
 0x5d4   : > { %2566 = vmatprep.subr.bf16.mxu0 %v2981_v5 }
 0x5d5   : > { %2549 = vmatmul.mubr.msk.bf16.vlgmr.msra.gmra.mrb[24].mxu1 %vm1065_vm4, %v1470_v1 }
 0x5d6   : > { %2588 = vmatprep.mubr.msk.bf16.mxu1 %vm2982_vm0, %v2981_v5  ;;  %2573 = vmatpush3.bf16.msra.mxu1 %v2782_v53 }
 0x5d7   : > { %2567 = vmatpush3.bf16.msra.mxu0 %v2781_v16  ;;  %2574 = vmatprep.subr.bf16.mxu1 %v2981_v5 }
 0x5d8   : > { %2592 = vmatprep.subr.bf16.mxu0 %v2981_v5 }
 0x5da   : > { %2575 = vmatpush3.bf16.msra.mxu1 %v2783_v2 }
 0x5db   : > { %2576 = vmatprep.subr.bf16.mxu1 %v2981_v5 }
 0x5de   : > { %2577 = vmatpush3.bf16.msra.mxu1 %v2784_v60 }
 0x5df   : > { %2578 = vmatprep.subr.bf16.mxu1 %v2981_v5 }
 0x5e2   : > { %2579 = vmatpush3.bf16.msra.mxu1 %v2785_v3 }
 0x5e3   : > { %2580 = vmatprep.subr.bf16.mxu1 %v2981_v5 }
 0x5e6   : > { %2581 = vmatpush3.bf16.msra.mxu1 %v2786_v4 }
 0x5e7   : > { %2582 = vmatprep.subr.bf16.mxu1 %v2981_v5 }
 0x5ea   : > { %2583 = vmatpush3.bf16.msra.mxu1 %v2787_v6 }
 0x5eb   : > { %2584 = vmatprep.subr.bf16.mxu1 %v2981_v5 }
 0x698   : > { %v1263_v7 = vpop.f32.mrb[16].mxu1 }
 0x699   : > { %v2526_v8 = vpop.f32.mrb[17].mxu1 }
 0x69a   : > { %v1266_v10 = vpop.f32.mrb[18].mxu1  ;;  %v2789_v8 = vld [vmem:[%s3268_s3 + $0x38] sm:$0xff]  }
 0x69b   : > { %v2727_v11 = vpack.i.bf16 %v1266_v10, %v1263_v7  ;;  %v2527_v12 = vpop.f32.mrb[19].mxu1  ;;  %v2788_v7 = vld [vmem:[%s3268_s3 + $0x30] sm:$0xff]   ;;  %v2791_v10 = vld [vmem:[%s3216_s11 + $0x8] sm:$0xff]  }
 0x69c   : > { %2585 = vmatpush3.bf16.msra.mxu1 %v2788_v7  ;;  %v2793_v12 = vld [vmem:[%s3216_s11 + $0x18] sm:$0xff]  }
 0x69d   : > { %2728 = vrot.lane.b32.xlu1 %v2727_v11, %s2985_s5  ;;  %2586 = vmatprep.subr.bf16.mxu1 %v2981_v5  ;;  %v2792_v11 = vld [vmem:[%s3216_s11 + $0x10] sm:$0xff]  }
 0x6a0   : > { %v1388_v14 = vpop.f32.mrb[20].mxu1  ;;  %2587 = vmatpush3.bf16.msra.mxu1 %v2789_v8 }
 0x6a1   : > { %v2538_v15 = vpop.f32.mrb[21].mxu1 }
 0x6a2   : > { %v1391_v17 = vpop.f32.mrb[22].mxu1 }
 0x6a3   : > { %v2732_v18 = vpack.i.bf16 %v1391_v17, %v1388_v14  ;;  %v2539_v19 = vpop.f32.mrb[23].mxu1  ;;  %v2795_v14 = vld [vmem:[%s3216_s11 + $0x28] sm:$0xff]  }
 0x6a5   : > { %2733 = vrot.lane.b32.xlu0 %v2732_v18, %s2986_s6 }
 0x6a8   : > { %v1513_v20 = vpop.f32.mrb[24].mxu1 }
 0x6a9   : > { %v2550_v21 = vpop.f32.mrb[25].mxu1 }
 0x6aa   : > { %v1516_v22 = vpop.f32.mrb[26].mxu1 }
 0x6ab   : > { %v2737_v23 = vpack.i.bf16 %v1516_v22, %v1513_v20  ;;  %v2551_v24 = vpop.f32.mrb[27].mxu1 }
 0x6ad   : > { %2738 = vrot.lane.b32.xlu1 %v2737_v23, %s2984_s2  ;;  %v2385_v23 = vld [vmem:[%s3623_s22] ss:$0 sm:$0xff] }
 0x70f   : > { %v2729_v27 = vpop.permute.xlu1 %2728 }
 0x710   : > { %v2731_v29 = vunpack.i.h.bf16 %v2729_v27  ;;  %v2730_v30 = vunpack.i.l.bf16 %v2729_v27 }
 0x712   : > { %v1545_v35 = vsel %vm1015_vm1, %v3382_v39, %v2731_v29  ;;  %v1544_v37 = vsel %vm1015_vm1, %v3380_v36, %v2730_v30  ;;  %v2376_v39 = vld [vmem:[%s3621_s27] ss:$0 sm:$0xff] }
 0x713   : > { %v2386_v29 = vld [vmem:[%s3625_s24] ss:$0 sm:$0xff] }
 0x717   : > { %v2734_v28 = vpop.permute.xlu0 %2733 }
 0x718   : > { %v2736_v32 = vunpack.i.h.bf16 %v2734_v28  ;;  %v2735_v33 = vunpack.i.l.bf16 %v2734_v28 }
 0x71a   : > { %v1548_v41 = vsel %vm1546_vm6, %v1545_v35, %v2736_v32  ;;  %v1547_v42 = vsel %vm1546_vm6, %v1544_v37, %v2735_v33  ;;  %v2796_v35 = vld [vmem:[%s3216_s11 + $0x30] sm:$0xff]   ;;  %v2797_v37 = vld [vmem:[%s3216_s11 + $0x38] sm:$0xff]  }
 0x71f   : > { %v2739_v34 = vpop.permute.xlu1 %2738 }
 0x720   : > { %v2741_v38 = vunpack.i.h.bf16 %v2739_v34  ;;  %v2740_v40 = vunpack.i.l.bf16 %v2739_v34 }
 0x722   : > { %v1551_v43 = vsel %vm1549_vm7, %v1548_v41, %v2741_v38  ;;  %v1550_v44 = vsel %vm1549_vm7, %v1547_v42, %v2740_v40  ;;  %v2387_v38 = vld [vmem:[%s721_s10] ss:$0 sm:$0xff] }
 0x723   : > { %v1552_v45 = vpack.c.bf16 %v1551_v43, %v1550_v44 }
 0x725   : > { %2569 = vmatmul.mubr.bf16.vlgmr.msra.gmra.mrb[12].mxu0 %v1552_v45 }
 0x726   : > { %2608 = vmatprep.mubr.msk.bf16.mxu0 %vm2982_vm0, %v2981_v5  ;;  %2593 = vmatpush3.bf16.msra.mxu0 %v2790_v9 }
 0x727   : > { %2594 = vmatprep.subr.bf16.mxu0 %v2981_v5 }
 0x72a   : > { %2595 = vmatpush3.bf16.msra.mxu0 %v2791_v10  ;;  %v2406_v10 = vld [vmem:[%s730_s1] ss:$0 sm:$0xff] }
 0x72b   : > { %2596 = vmatprep.subr.bf16.mxu0 %v2981_v5 }
 0x72e   : > { %2597 = vmatpush3.bf16.msra.mxu0 %v2792_v11 }
 0x72f   : > { %2598 = vmatprep.subr.bf16.mxu0 %v2981_v5 }
 0x732   : > { %2599 = vmatpush3.bf16.msra.mxu0 %v2793_v12 }
 0x733   : > { %2600 = vmatprep.subr.bf16.mxu0 %v2981_v5 }
 0x736   : > { %2601 = vmatpush3.bf16.msra.mxu0 %v2794_v13 }
 0x737   : > { %2602 = vmatprep.subr.bf16.mxu0 %v2981_v5 }
 0x73a   : > { %2603 = vmatpush3.bf16.msra.mxu0 %v2795_v14 }
 0x73b   : > { %2604 = vmatprep.subr.bf16.mxu0 %v2981_v5 }
 0x73e   : > { %2605 = vmatpush3.bf16.msra.mxu0 %v2796_v35  ;;  %v2408_v35 = vld [vmem:[%s3629_s13] ss:$0 sm:$0xff] (!%p2407_p8) }
 0x73f   : > { %2606 = vmatprep.subr.bf16.mxu0 %v2981_v5 }
 0x742   : > { %2607 = vmatpush3.bf16.msra.mxu0 %v2797_v37 }
 0x7f8   : > { %v1658_v46 = vpop.f32.mrb[12].mxu0 }
 0x7f9   : > { %v1659_v47 = vadd.f32 %v2376_v39, %v1658_v46  ;;  %v2570_v36 = vpop.f32.mrb[13].mxu0 }
 0x7fa   : > { %v1661_v48 = vpop.f32.mrb[14].mxu0 }
 0x7fb   : > { %v1662_v57 = vadd.f32 %v2376_v39, %v1661_v48  ;;  %v2571_v49 = vpop.f32.mrb[15].mxu0  ;;  %v1665_v50 = vadd.f32 %v1659_v47, %v3317_v25  ;;  %v3454_v25 = vsel %vm748_vm9, 1.0, %v2981_v5  ;;  %v2396_v5 = vld [vmem:[%s724_s29] ss:$0 sm:$0xff] }
 0x7fd   : > { %1669 = vadd.xlane.f32.xlu1 %v1665_v50  ;;  %v1666_v51 = vadd.f32 %v1662_v57, %v3319_v26 }
 0x7ff   : > { %v1672_v52 = vsel %vm1671_vm8, %v1666_v51, 0.0 }
 0x800   : > { %1673 = vadd.xlane.f32.xlu0 %v1672_v52 }
 0x88a   : > { %v1670_v55 = vpop.xlane.xlu1 %1669 }
 0x88b   : > { %v1675_v56 = vmul.f32 0.03125, %v1670_v55 }
 0x88d   : > { %v1677_v58 = vsub.f32 %v1665_v50, %v1675_v56  ;;  %v1674_v59 = vpop.xlane.xlu0 %1673 }
 0x88e   : > { %v1676_v26 = vmul.f32 0.03125, %v1674_v59 }
 0x88f   : > { %v1679_v61 = vmul.f32 %v3454_v25, %v1677_v58 }
 0x890   : > { %v1678_v62 = vsub.f32 %v1666_v51, %v1676_v26 }
 0x891   : > { %v1681_v63 = vmul.f32 %v1679_v61, %v1679_v61 }
 0x892   : > { %v1680_v0 = vmul.f32 %v3454_v25, %v1678_v62 }
 0x893   : > { %1683 = vadd.xlane.f32.xlu0 %v1681_v63 }
 0x894   : > { %v1682_v31 = vmul.f32 %v1680_v0, %v1680_v0 }
 0x896   : > { %v1685_v1 = vsel %vm1671_vm8, %v1682_v31, 0.0 }
 0x897   : > { %1686 = vadd.xlane.f32.xlu0 %v1685_v1 }
 0x920   : > { %v1684_v15 = vpop.xlane.xlu0 %1683 }
 0x921   : > { %v1688_v16 = vmul.f32 0.03125, %v1684_v15 }
 0x923   : > { %v1690_v17 = vadd.f32 1e-05, %v1688_v16 }
 0x924   : > { %v1687_v18 = vpop.xlane.xlu0 %1686 }
 0x925   : > { %2830 = vrsqrt.f32 %v1690_v17  ;;  %v1689_v19 = vmul.f32 0.03125, %v1687_v18  ;;  %v2838_v17 = vld [vmem:[#allocation5] sm:$0xff] (!%p2407_p8)   ;;  %v2987_v18 = vmov (!%p2407_p8), 0.0  }
 0x926   : > { %2612 = vmatprep.subr.bf16.mxu0 (!%p2407_p8), %v2987_v18 }
 0x927   : > { %v1691_v20 = vadd.f32 1e-05, %v1689_v19  ;;  %v2839_v19 = vld [vmem:[#allocation5 + $0x8] sm:$0xff] (!%p2407_p8)  }
 0x929   : > { %2832 = vrsqrt.f32 %v1691_v20  ;;  %v2840_v20 = vld [vmem:[#allocation5 + $0x10] sm:$0xff] (!%p2407_p8)  }
 0x92f   : > { %v2831_v21 = vpop.eup %2830 }
 0x930   : > { %v1694_v22 = vmul.f32 %v2831_v21, %v1679_v61  ;;  %v2841_v21 = vld [vmem:[#allocation5 + $0x18] sm:$0xff] (!%p2407_p8)  }
 0x932   : > { %v1702_v28 = vmul.f32 %v2385_v23, %v1694_v22  ;;  %v2842_v22 = vld [vmem:[#allocation5 + $0x20] sm:$0xff] (!%p2407_p8)  }
 0x933   : > { %v2833_v24 = vpop.eup %2832 }
 0x934   : > { %v1695_v27 = vmul.f32 %v2833_v24, %v1680_v0  ;;  %v1710_v32 = vadd.f32 %v2386_v29, %v1702_v28  ;;  %v2843_v24 = vld [vmem:[#allocation5 + $0x28] sm:$0xff] (!%p2407_p8)  }
 0x936   : > { %v1703_v30 = vmul.f32 %v2385_v23, %v1695_v27 }
 0x938   : > { %v1711_v33 = vadd.f32 %v2386_v29, %v1703_v30  ;;  %v2844_v29 = vld [vmem:[#allocation5 + $0x30] sm:$0xff] (!%p2407_p8)  }
 0x93a   : > { %v1712_v34 = vpack.c.bf16 %v1711_v33, %v1710_v32 }
 0x93c   : > { %2589 = vmatmul.mubr.bf16.vlgmr.msra.gmra.mrb[28].mxu1 %v1712_v34 }
 0xa0f   : > { %v1818_v40 = vpop.f32.mrb[28].mxu1 }
 0xa10   : > { %v1819_v41 = vadd.f32 %v2387_v38, %v1818_v40  ;;  %v2590_v42 = vpop.f32.mrb[29].mxu1 }
 0xa11   : > { %v1821_v43 = vpop.f32.mrb[30].mxu1 }
 0xa12   : > { %v1822_v44 = vadd.f32 %v2387_v38, %v1821_v43  ;;  %v2591_v45 = vpop.f32.mrb[31].mxu1  ;;  %v1825_v39 = vmax.f32 %v1819_v41, 0.0 }
 0xa14   : > { %v1826_v46 = vmax.f32 %v1822_v44, 0.0 }
 0xa16   : > { %v1827_v47 = vpack.c.bf16 %v1826_v46, %v1825_v39 }
 0xa18   : > { %2609 = vmatmul.mubr.bf16.vlgmr.msra.gmra.mrb[16].mxu0 %v1827_v47 }
 0xa19   : > { %2613 = vmatpush3.bf16.msra.mxu0 (!%p2407_p8), %v2838_v17  ;;  %2628 = vmatprep.mubr.msk.bf16.mxu0 (!%p2407_p8), %vm2988_vm10, %v2987_v18 }
 0xa1a   : > { %2614 = vmatprep.subr.bf16.mxu0 (!%p2407_p8), %v2987_v18 }
 0xa1d   : > { %2615 = vmatpush3.bf16.msra.mxu0 (!%p2407_p8), %v2839_v19 }
 0xa1e   : > { %2616 = vmatprep.subr.bf16.mxu0 (!%p2407_p8), %v2987_v18 }
 0xa21   : > { %2617 = vmatpush3.bf16.msra.mxu0 (!%p2407_p8), %v2840_v20 }
 0xa22   : > { %2618 = vmatprep.subr.bf16.mxu0 (!%p2407_p8), %v2987_v18 }
 0xa25   : > { %2619 = vmatpush3.bf16.msra.mxu0 (!%p2407_p8), %v2841_v21 }
 0xa26   : > { %2620 = vmatprep.subr.bf16.mxu0 (!%p2407_p8), %v2987_v18 }
 0xa29   : > { %2621 = vmatpush3.bf16.msra.mxu0 (!%p2407_p8), %v2842_v22 }
 0xa2a   : > { %2622 = vmatprep.subr.bf16.mxu0 (!%p2407_p8), %v2987_v18 }
 0xa2d   : > { %2623 = vmatpush3.bf16.msra.mxu0 (!%p2407_p8), %v2843_v24 }
 0xa2e   : > { %2624 = vmatprep.subr.bf16.mxu0 (!%p2407_p8), %v2987_v18 }
 0xa31   : > { %2625 = vmatpush3.bf16.msra.mxu0 (!%p2407_p8), %v2844_v29 }
 0xa32   : > { %2626 = vmatprep.subr.bf16.mxu0 (!%p2407_p8), %v2987_v18 }
 0xaeb   : > { %v1933_v36 = vpop.f32.mrb[16].mxu0 }
 0xaec   : > { %v1934_v48 = vadd.f32 %v2396_v5, %v1933_v36  ;;  %v2610_v57 = vpop.f32.mrb[17].mxu0 }
 0xaed   : > { %v1936_v49 = vpop.f32.mrb[18].mxu0 }
 0xaee   : > { %v1937_v50 = vadd.f32 %v2396_v5, %v1936_v49  ;;  %v2611_v51 = vpop.f32.mrb[19].mxu0  ;;  %v1940_v52 = vadd.f32 %v1934_v48, %v1710_v32 }
 0xaf0   : > { %1944 = vadd.xlane.f32.xlu1 %v1940_v52  ;;  %v1941_v53 = vadd.f32 %v1937_v50, %v1711_v33  ;;  %v2845_v33 = vld [vmem:[#allocation5 + $0x38] sm:$0xff] (!%p2407_p8)  }
 0xaf1   : > { %2627 = vmatpush3.bf16.msra.mxu0 (!%p2407_p8), %v2845_v33 }
 0xaf2   : > { %v1946_v54 = vsel %vm1671_vm8, %v1941_v53, 0.0 }
 0xaf3   : > { %1947 = vadd.xlane.f32.xlu0 %v1946_v54 }
 0xb7d   : > { %v1945_v55 = vpop.xlane.xlu1 %1944 }
 0xb7e   : > { %v1949_v56 = vmul.f32 0.03125, %v1945_v55 }
 0xb80   : > { %v1951_v58 = vsub.f32 %v1940_v52, %v1949_v56  ;;  %v1948_v59 = vpop.xlane.xlu0 %1947 }
 0xb81   : > { %v1950_v26 = vmul.f32 0.03125, %v1948_v59 }
 0xb82   : > { %v1953_v61 = vmul.f32 %v3454_v25, %v1951_v58 }
 0xb83   : > { %v1952_v62 = vsub.f32 %v1941_v53, %v1950_v26 }
 0xb84   : > { %v1955_v63 = vmul.f32 %v1953_v61, %v1953_v61 }
 0xb85   : > { %v1954_v0 = vmul.f32 %v3454_v25, %v1952_v62  ;;  %v2405_v25 = vld [vmem:[%s727_s15] ss:$0 sm:$0xff] }
 0xb86   : > { %1957 = vadd.xlane.f32.xlu0 %v1955_v63 }
 0xb87   : > { %v1956_v31 = vmul.f32 %v1954_v0, %v1954_v0 }
 0xb89   : > { %v1959_v1 = vsel %vm1671_vm8, %v1956_v31, 0.0 }
 0xb8a   : > { %1960 = vadd.xlane.f32.xlu1 %v1959_v1 }
 0xc13   : > { %v1958_v2 = vpop.xlane.xlu0 %1957 }
 0xc14   : > { %v1962_v60 = vmul.f32 0.03125, %v1958_v2 }
 0xc16   : > { %v1964_v3 = vadd.f32 1e-05, %v1962_v60 }
 0xc17   : > { %v1961_v4 = vpop.xlane.xlu1 %1960 }
 0xc18   : > { %2834 = vrsqrt.f32 %v1964_v3  ;;  %v1963_v6 = vmul.f32 0.03125, %v1961_v4 }
 0xc1a   : > { %v1965_v7 = vadd.f32 1e-05, %v1963_v6 }
 0xc1c   : > { %2836 = vrsqrt.f32 %v1965_v7 }
 0xc22   : > { %v2835_v8 = vpop.eup %2834 }
 0xc23   : > { %v1968_v9 = vmul.f32 %v2835_v8, %v1953_v61 }
 0xc25   : > { %v1976_v11 = vmul.f32 %v2405_v25, %v1968_v9 }
 0xc26   : > { %v2837_v12 = vpop.eup %2836 }
 0xc27   : > { %v1984_v13 = vadd.f32 %v2406_v10, %v1976_v11  ;;  %v1969_v14 = vmul.f32 %v2837_v12, %v1954_v0  ;;  %1991 = sbr.rel (%p2407_p8) target bundleno = 3340 (0xd0c), region = 96 }
 0xc29   : > { %1986 = vst [vmem:[#allocation2] sm:$0xff] %v1984_v13  ;;  %v1977_v15 = vmul.f32 %v2405_v25, %v1969_v14 }
 0xc2b   : > { %v1985_v16 = vadd.f32 %v2406_v10, %v1977_v15 }
 0xc2d   : > { %1987 = vst [vmem:[#allocation2 + $0x8] sm:$0x1f] %v1985_v16  ;;  %v1992_v23 = vpack.c.bf16 (!%p2407_p8), %v1985_v16, %v1984_v13 }
 0xc2f   : > { %v2017_v27 = vshrl.u32 %v1992_v23, 16  ;;  %v2020_v28 = vshll.u32 %v1992_v23, 16 }
 0xc31   : > { %v2019_v30 = vrot.slane %v2017_v27, 2  ;;  %v2022_v32 = vrot.slane %v2020_v28, 3 }
 0xc33   : > { %v2023_v34 = vor.u32 %v2022_v32, %v2019_v30 }
 0xc35   : > { %2629 = vmatmul.mubr.bf16.vlgmr.msra.gmra.mrb[0].mxu0 %v2023_v34 }
 0xd08   : > { %v2107_v37 = vpop.f32.mrb[0].mxu0 }
 0xd09   : > { %v2108_v38 = vadd.f32 %v2408_v35, %v2107_v37  ;;  %v2630_v40 = vpop.f32.mrb[1].mxu0 }
 0xd0a   : > { %v2110_v41 = vpop.f32.mrb[2].mxu0 }
 0xd0b   : > { %2113 = vst [vmem:[%s3289_s30] sm:$0xff] %v2108_v38  ;;  %v2631_v42 = vpop.f32.mrb[3].mxu0 }
 0xd0c PF: > { %s3630_s15 = sld [smem:[#allocation13_spill]]  ;;  %s3631_s18 = sld [smem:[#allocation9_spill]] }
 0xd0d   : > { %s3632_s19 = sld [smem:[#allocation10_spill]]  ;;  %s3633_s20 = sld [smem:[#allocation16_spill]] }
 0xd0e   : > { %s3634_s21 = sld [smem:[#allocation11_spill]]  ;;  %s3635_s22 = sld [smem:[#allocation12_spill]] }
 0xd0f   : > { %s3636_s23 = sld [smem:[#allocation14_spill]]  ;;  %s3637_s24 = sld [smem:[#allocation15_spill]] }
 0xd12   : > { %s29_s25 = sadd.s32 1, %s3630_s15  }
 0xd13   : > { %p26_p9 = scmp.ge.s32.totalorder %s29_s25, 6  }
 0xd15   :  { %28 = sbr.rel (!%p26_p9) target bundleno = 20 (0x14), region = 168 }
 0xd1c   :  { %2133 = vsyncpa [#allocation4], 1 }
 0xd1d   :  { %2135 = vsyncpa [#allocation4 + $0x1], 1 }
 0xd1e   :  { %2136 = vsyncpa [#allocation6], 1 }

</bundles_post_ra>
